<compile_context>
chip_gen: v7x
topology: tpu7x:2x2x1
jax: 0.10.0
libtpu: 0.0.40
codegen_flags: <defaults>
</compile_context>

<pallas_src>
import math

import jax
import jax.numpy as jnp
from jax.experimental import pallas as pl
from jax.experimental.pallas import tpu as pltpu

LANE = 128


def _round_up(x, m):
    return ((x + m - 1) // m) * m


def _gru_gate_math(gi, gh, h, bhn, hp):
    """gi: x@W_ih + (b_i folded), gh: h@W_hh (no bias), bhn: b_hn only."""
    r = jax.nn.sigmoid(gi[:, 0:hp] + gh[:, 0:hp])
    z = jax.nn.sigmoid(gi[:, hp:2 * hp] + gh[:, hp:2 * hp])
    n = jnp.tanh(gi[:, 2 * hp:3 * hp] + r * (gh[:, 2 * hp:3 * hp] + bhn))
    return (1.0 - z) * n + z * h


# ------------------------- fast path: everything resident --------------------
def fused_small_kernel(x_ref, h_ref, wih0_ref, wihr_ref, whh_ref,
                       bi_ref, bhn_ref, o_ref):
    """Whole stack in one invocation; static (unrolled) loop over layers."""
    L = h_ref.shape[0]
    hp = h_ref.shape[-1]
    wdt = whh_ref.dtype

    inp = x_ref[...].astype(jnp.float32)          # (B, IN_PAD)
    for l in range(L):
        h = h_ref[l].astype(jnp.float32)          # (B, H_PAD)
        if l == 0:
            gi = jnp.dot(inp.astype(wdt), wih0_ref[...],
                         preferred_element_type=jnp.float32)
        else:
            gi = jnp.dot(inp.astype(wdt), wihr_ref[l - 1],
                         preferred_element_type=jnp.float32)
        gi = gi + bi_ref[l]
        gh = jnp.dot(h.astype(wdt), whh_ref[l],
                     preferred_element_type=jnp.float32)
        h_new = _gru_gate_math(gi, gh, h, bhn_ref[l], hp)
        o_ref[l] = h_new.astype(o_ref.dtype)
        # TODO(synk): training-mode dropout between layers (eval identity).
        inp = h_new                                # carried in vregs


# ------------------------- grid path: one grid step per layer ----------------
def gru_layer_kernel(x_ref, h_ref, wih0_ref, wihr_ref, whh_ref,
                     bi_ref, bhn_ref, o_ref, carry_ref, gi_ref):
    """One grid step == one GRU layer; carry_ref holds the previous layer output."""
    layer = pl.program_id(0)
    hp = h_ref.shape[-1]
    wdt = whh_ref.dtype

    @pl.when(layer == 0)
    def _():
        gi_ref[...] = jnp.dot(x_ref[...].astype(wdt), wih0_ref[...],
                              preferred_element_type=jnp.float32)

    @pl.when(layer > 0)
    def _():
        gi_ref[...] = jnp.dot(carry_ref[...].astype(wdt), wihr_ref[0],
                              preferred_element_type=jnp.float32)

    h = h_ref[0].astype(jnp.float32)
    gi = gi_ref[...] + bi_ref[0]
    gh = jnp.dot(h.astype(wdt), whh_ref[0], preferred_element_type=jnp.float32)

    h_new = _gru_gate_math(gi, gh, h, bhn_ref[0], hp)

    o_ref[0] = h_new.astype(o_ref.dtype)
    # TODO(synk): training-mode dropout between layers (eval identity).
    carry_ref[...] = h_new


# --------------------------------- wrapper -----------------------------------
def stacking_gru_cell(x, h0, packed, *, force_grid=False):
    """Equivalent of StackingGRUCell.forward (eval mode).

    Returns (output, hn):
      output : (B, H)     -- final layer's new hidden state
      hn     : (L, B, H)  -- new hidden state of each layer
    """
    (wih0, wihr, whh, bi, bhn, hidden_size, input_size, H_PAD, IN_PAD) = packed
    L = whh.shape[0]
    B = x.shape[0]
    assert x.shape == (B, input_size)
    assert h0.shape == (L, B, hidden_size)

    # Zero-pad activations to the lane-dense kernel layout (kept f32 so stores
    # are unmasked full-lane vst regardless of B).
    x_pad = jnp.zeros((B, IN_PAD), jnp.float32).at[:, :input_size].set(
        x.astype(jnp.float32))
    h0_pad = jnp.zeros((L, B, H_PAD), jnp.float32).at[:, :, :hidden_size].set(
        h0.astype(jnp.float32))

    wbytes = jnp.dtype(whh.dtype).itemsize
    weight_bytes = (wih0.size + wihr.size + whh.size) * wbytes
    act_bytes = (x_pad.size + h0_pad.size + L * B * H_PAD) * 4
    bias_bytes = (bi.size + bhn.size) * 4
    total_resident = weight_bytes + act_bytes + bias_bytes

    use_fast = (not force_grid) and total_resident <= 8 * 1024 * 1024

    if use_fast:
        # Single invocation; all params + activations live in VMEM.
        hn_pad = pl.pallas_call(
            fused_small_kernel,
            out_shape=jax.ShapeDtypeStruct((L, B, H_PAD), jnp.float32),
        )(x_pad, h0_pad, wih0, wihr, whh, bi, bhn)
    else:
        # Per-grid-step double-buffered working set -> explicit scoped VMEM limit.
        block_bytes = (wih0.size + 2 * H_PAD * 3 * H_PAD) * wbytes \
            + (B * IN_PAD + 2 * B * H_PAD) * 4 + (4 * H_PAD) * 4
        scratch_bytes = (B * H_PAD + B * 3 * H_PAD) * 4
        need = 2 * block_bytes + scratch_bytes
        vmem_limit = int(min(max(2 * need, 16 * 2**20), 120 * 2**20))

        hn_pad = pl.pallas_call(
            gru_layer_kernel,
            out_shape=jax.ShapeDtypeStruct((L, B, H_PAD), jnp.float32),
            grid_spec=pltpu.PrefetchScalarGridSpec(
                num_scalar_prefetch=0,
                grid=(L,),
                in_specs=[
                    pl.BlockSpec((B, IN_PAD), lambda l: (0, 0)),          # x (resident)
                    pl.BlockSpec((1, B, H_PAD), lambda l: (l, 0, 0)),     # h0[l]
                    pl.BlockSpec((IN_PAD, 3 * H_PAD), lambda l: (0, 0)),  # W_ih layer 0
                    pl.BlockSpec((1, H_PAD, 3 * H_PAD),                   # W_ih layers >=1
                                 lambda l: (jnp.maximum(l - 1, 0), 0, 0)),
                    pl.BlockSpec((1, H_PAD, 3 * H_PAD), lambda l: (l, 0, 0)),  # W_hh[l]
                    pl.BlockSpec((1, 1, 3 * H_PAD), lambda l: (l, 0, 0)),      # folded b_i[l]
                    pl.BlockSpec((1, 1, H_PAD), lambda l: (l, 0, 0)),          # b_hn[l]
                ],
                out_specs=pl.BlockSpec((1, B, H_PAD), lambda l: (l, 0, 0)),
                scratch_shapes=[pltpu.VMEM((B, H_PAD), jnp.float32),       # layer carry
                                pltpu.VMEM((B, 3 * H_PAD), jnp.float32)],  # gi
            ),
            compiler_params=pltpu.CompilerParams(
                dimension_semantics=("arbitrary",),   # layer l depends on layer l-1
                vmem_limit_bytes=vmem_limit),
        )(x_pad, h0_pad, wih0, wihr, whh, bi, bhn)

    hn = hn_pad[:, :, :hidden_size].astype(x.dtype)
    return hn[-1], hn


# ------------------ host-side parameter packing (fused layout) ---------------
def pack_params(params, input_size, hidden_size, weight_dtype=jnp.bfloat16):
    """params[l] = (weight_ih (3,H,in_f), weight_hh (3,H,H), bias_ih (3,H), bias_hh (3,H))
    in PyTorch per-gate layout, gate order [r, z, n].

    Produces zero-padded, gate-fused arrays (weights cast to `weight_dtype`):
      wih0 : (IN_PAD, 3*H_PAD)            layer 0's W_ih (transposed, x @ W layout)
      wihr : (max(L-1,1), H_PAD, 3*H_PAD) W_ih for layers 1..L-1 (K = H_PAD only)
      whh  : (L, H_PAD, 3*H_PAD)
      bi   : (L, 1, 3*H_PAD) f32          [b_ir+b_hr, b_iz+b_hz, b_in]
      bhn  : (L, 1, H_PAD)   f32          b_hn only (added inside the n gate)
    """
    L = len(params)
    H = hidden_size
    H_PAD = _round_up(H, LANE)
    IN_PAD = _round_up(input_size, LANE)

    wih0 = jnp.zeros((IN_PAD, 3 * H_PAD), jnp.float32)
    wihr = jnp.zeros((max(L - 1, 1), H_PAD, 3 * H_PAD), jnp.float32)
    whh = jnp.zeros((L, H_PAD, 3 * H_PAD), jnp.float32)
    bi = jnp.zeros((L, 1, 3 * H_PAD), jnp.float32)
    bhn = jnp.zeros((L, 1, H_PAD), jnp.float32)

    for l, (w_ih, w_hh, b_ih, b_hh) in enumerate(params):
        in_f = w_ih.shape[-1]
        for g in range(3):
            if l == 0:
                wih0 = wih0.at[:in_f, g * H_PAD:g * H_PAD + H].set(w_ih[g].T)
            else:
                wihr = wihr.at[l - 1, :in_f, g * H_PAD:g * H_PAD + H].set(w_ih[g].T)
            whh = whh.at[l, :H, g * H_PAD:g * H_PAD + H].set(w_hh[g].T)
        # fold b_ih + b_hh for the r and z gates; keep b_in / b_hn separate.
        bi = bi.at[l, 0, 0 * H_PAD:0 * H_PAD + H].set(b_ih[0] + b_hh[0])
        bi = bi.at[l, 0, 1 * H_PAD:1 * H_PAD + H].set(b_ih[1] + b_hh[1])
        bi = bi.at[l, 0, 2 * H_PAD:2 * H_PAD + H].set(b_ih[2])
        bhn = bhn.at[l, 0, :H].set(b_hh[2])

    wih0 = wih0.astype(weight_dtype)
    wihr = wihr.astype(weight_dtype)
    whh = whh.astype(weight_dtype)
    return (wih0, wihr, whh, bi, bhn, hidden_size, input_size, H_PAD, IN_PAD)


# ----------------------- pure-JAX reference (for checking) -------------------
def gru_cell_ref(x, h, w_ih, w_hh, b_ih, b_hh):
    gi = jnp.einsum("bi,ghi->gbh", x, w_ih) + b_ih[:, None, :]
    gh = jnp.einsum("bj,gkj->gbk", h, w_hh) + b_hh[:, None, :]
    r = jax.nn.sigmoid(gi[0] + gh[0])
    z = jax.nn.sigmoid(gi[1] + gh[1])
    n = jnp.tanh(gi[2] + r * gh[2])
    return (1.0 - z) * n + z * h


def stacking_gru_cell_ref(x, h0, params):
    output = x
    hn = []
    for i, (w_ih, w_hh, b_ih, b_hh) in enumerate(params):
        hn_i = gru_cell_ref(output, h0[i], w_ih, w_hh, b_ih, b_hh)
        hn.append(hn_i)
        output = hn_i
    return output, jnp.stack(hn)


# ----------------------- deterministic parameter construction ----------------
def init_params(key, input_size, hidden_size, num_layers):
    """Mimics nn.GRUCell init: uniform(-1/sqrt(H), 1/sqrt(H)), gate order [r,z,n]."""
    k = 1.0 / math.sqrt(hidden_size)
    params = []
    for layer in range(num_layers):
        in_f = input_size if layer == 0 else hidden_size
        key, k1, k2, k3, k4 = jax.random.split(key, 5)
        weight_ih = jax.random.uniform(k1, (3, hidden_size, in_f), jnp.float32, -k, k)
        weight_hh = jax.random.uniform(k2, (3, hidden_size, hidden_size), jnp.float32, -k, k)
        bias_ih = jax.random.uniform(k3, (3, hidden_size), jnp.float32, -k, k)
        bias_hh = jax.random.uniform(k4, (3, hidden_size), jnp.float32, -k, k)
        params.append((weight_ih, weight_hh, bias_ih, bias_hh))
    return params


if __name__ == "__main__":
    B = 8
    INPUT_SIZE = 16
    HIDDEN_SIZE = 32
    NUM_LAYERS = 3

    root = jax.random.PRNGKey(0)
    kx, kh, kp = jax.random.split(root, 3)

    x = jax.random.normal(kx, (B, INPUT_SIZE), jnp.float32)
    h0 = jax.random.normal(kh, (NUM_LAYERS, B, HIDDEN_SIZE), jnp.float32)
    params = init_params(kp, INPUT_SIZE, HIDDEN_SIZE, NUM_LAYERS)

    out_ref, hn_ref = stacking_gru_cell_ref(x, h0, params)

    # --- f32 weights: exact-precision check on both code paths ---------------
    packed_f32 = pack_params(params, INPUT_SIZE, HIDDEN_SIZE, weight_dtype=jnp.float32)
    for force_grid in (False, True):
        out, hn = stacking_gru_cell(x, h0, packed_f32, force_grid=force_grid)
        out = jax.block_until_ready(out)
        hn = jax.block_until_ready(hn)
        assert out.shape == (B, HIDDEN_SIZE)
        assert hn.shape == (NUM_LAYERS, B, HIDDEN_SIZE)
        assert jnp.allclose(out, out_ref, atol=1e-4, rtol=1e-4)
        assert jnp.allclose(hn, hn_ref, atol=1e-4, rtol=1e-4)

    # --- bf16 weight streaming (default packing): looser tolerance -----------
    packed_bf16 = pack_params(params, INPUT_SIZE, HIDDEN_SIZE)  # bfloat16 default
    for force_grid in (False, True):
        out, hn = stacking_gru_cell(x, h0, packed_bf16, force_grid=force_grid)
        out = jax.block_until_ready(out)
        hn = jax.block_until_ready(hn)
        assert out.shape == (B, HIDDEN_SIZE)
        assert hn.shape == (NUM_LAYERS, B, HIDDEN_SIZE)
        assert jnp.allclose(out, out_ref, atol=2e-2, rtol=2e-2)
        assert jnp.allclose(hn, hn_ref, atol=2e-2, rtol=2e-2)

    print("KERNEL_OK")
</pallas_src>

<mosaic_0001>
module attributes {stable_mosaic.version = 11 : i64} {
  func.func @fused_small_kernel(%arg0: memref<8x128xf32, #tpu.memory_space<vmem>>, %arg1: memref<3x8x128xf32, #tpu.memory_space<vmem>>, %arg2: memref<128x384xf32, #tpu.memory_space<vmem>>, %arg3: memref<2x128x384xf32, #tpu.memory_space<vmem>>, %arg4: memref<3x128x384xf32, #tpu.memory_space<vmem>>, %arg5: memref<3x1x384xf32, #tpu.memory_space<vmem>>, %arg6: memref<3x1x128xf32, #tpu.memory_space<vmem>>, %arg7: memref<3x8x128xf32, #tpu.memory_space<vmem>>) attributes {dimension_semantics = [], scalar_prefetch = 0 : i64, scratch_operands = 0 : i64, tpu.core_type = #tpu.core_type<tc>} {
    %c0 = arith.constant 0 : index
    %c0_0 = arith.constant 0 : index
    %0 = vector.load %arg0[%c0, %c0_0] : memref<8x128xf32, #tpu.memory_space<vmem>>, vector<8x128xf32>
    %c0_1 = arith.constant 0 : index
    %c0_2 = arith.constant 0 : index
    %c0_3 = arith.constant 0 : index
    %1 = vector.load %arg1[%c0_1, %c0_2, %c0_3] : memref<3x8x128xf32, #tpu.memory_space<vmem>>, vector<1x8x128xf32>
    %2 = vector.shape_cast %1 : vector<1x8x128xf32> to vector<8x128xf32>
    %c0_4 = arith.constant 0 : index
    %c0_5 = arith.constant 0 : index
    %3 = vector.load %arg2[%c0_4, %c0_5] : memref<128x384xf32, #tpu.memory_space<vmem>>, vector<128x384xf32>
    %cst = arith.constant dense<0.000000e+00> : vector<8x384xf32>
    %4 = tpu.matmul %0, %3, %cst {dimension_numbers = #tpu.dot_dimension_numbers<[1], [0], [0], [1], [0, 0, 1, 1], [], []>} : vector<8x128xf32>, vector<128x384xf32>, vector<8x384xf32> -> vector<8x384xf32>
    %c0_6 = arith.constant 0 : index
    %c0_7 = arith.constant 0 : index
    %c0_8 = arith.constant 0 : index
    %5 = vector.load %arg5[%c0_6, %c0_7, %c0_8] : memref<3x1x384xf32, #tpu.memory_space<vmem>>, vector<1x1x384xf32>
    %6 = vector.shape_cast %5 : vector<1x1x384xf32> to vector<1x384xf32>
    %7 = vector.broadcast %6 : vector<1x384xf32> to vector<8x384xf32>
    %8 = arith.addf %4, %7 : vector<8x384xf32>
    %c0_9 = arith.constant 0 : index
    %c0_10 = arith.constant 0 : index
    %c0_11 = arith.constant 0 : index
    %9 = vector.load %arg4[%c0_9, %c0_10, %c0_11] : memref<3x128x384xf32, #tpu.memory_space<vmem>>, vector<1x128x384xf32>
    %10 = vector.shape_cast %9 : vector<1x128x384xf32> to vector<128x384xf32>
    %cst_12 = arith.constant dense<0.000000e+00> : vector<8x384xf32>
    %11 = tpu.matmul %2, %10, %cst_12 {dimension_numbers = #tpu.dot_dimension_numbers<[1], [0], [0], [1], [0, 0, 1, 1], [], []>} : vector<8x128xf32>, vector<128x384xf32>, vector<8x384xf32> -> vector<8x384xf32>
    %c0_13 = arith.constant 0 : index
    %c0_14 = arith.constant 0 : index
    %c0_15 = arith.constant 0 : index
    %12 = vector.load %arg6[%c0_13, %c0_14, %c0_15] : memref<3x1x128xf32, #tpu.memory_space<vmem>>, vector<1x1x128xf32>
    %13 = vector.shape_cast %12 : vector<1x1x128xf32> to vector<1x128xf32>
    %14 = vector.extract_strided_slice %8 {offsets = [0, 0], sizes = [8, 128], strides = [1, 1]} : vector<8x384xf32> to vector<8x128xf32>
    %15 = vector.extract_strided_slice %11 {offsets = [0, 0], sizes = [8, 128], strides = [1, 1]} : vector<8x384xf32> to vector<8x128xf32>
    %16 = arith.addf %14, %15 : vector<8x128xf32>
    %17 = arith.negf %16 : vector<8x128xf32>
    %18 = math.exp %17 : vector<8x128xf32>
    %cst_16 = arith.constant 1.000000e+00 : f32
    %19 = vector.broadcast %cst_16 : f32 to vector<8x128xf32>
    %20 = arith.addf %19, %18 : vector<8x128xf32>
    %21 = arith.divf %19, %20 : vector<8x128xf32>
    %22 = vector.extract_strided_slice %8 {offsets = [0, 128], sizes = [8, 128], strides = [1, 1]} : vector<8x384xf32> to vector<8x128xf32>
    %23 = vector.extract_strided_slice %11 {offsets = [0, 128], sizes = [8, 128], strides = [1, 1]} : vector<8x384xf32> to vector<8x128xf32>
    %24 = arith.addf %22, %23 : vector<8x128xf32>
    %25 = arith.negf %24 : vector<8x128xf32>
    %26 = math.exp %25 : vector<8x128xf32>
    %cst_17 = arith.constant 1.000000e+00 : f32
    %27 = vector.broadcast %cst_17 : f32 to vector<8x128xf32>
    %28 = arith.addf %27, %26 : vector<8x128xf32>
    %29 = arith.divf %27, %28 : vector<8x128xf32>
    %30 = vector.extract_strided_slice %8 {offsets = [0, 256], sizes = [8, 128], strides = [1, 1]} : vector<8x384xf32> to vector<8x128xf32>
    %31 = vector.extract_strided_slice %11 {offsets = [0, 256], sizes = [8, 128], strides = [1, 1]} : vector<8x384xf32> to vector<8x128xf32>
    %32 = vector.broadcast %13 : vector<1x128xf32> to vector<8x128xf32>
    %33 = arith.addf %31, %32 : vector<8x128xf32>
    %34 = arith.mulf %21, %33 : vector<8x128xf32>
    %35 = arith.addf %30, %34 : vector<8x128xf32>
    %36 = math.tanh %35 : vector<8x128xf32>
    %cst_18 = arith.constant 1.000000e+00 : f32
    %37 = vector.broadcast %cst_18 : f32 to vector<8x128xf32>
    %38 = arith.subf %37, %29 : vector<8x128xf32>
    %39 = arith.mulf %38, %36 : vector<8x128xf32>
    %40 = arith.mulf %29, %2 : vector<8x128xf32>
    %41 = arith.addf %39, %40 : vector<8x128xf32>
    %c0_19 = arith.constant 0 : index
    %c0_20 = arith.constant 0 : index
    %c0_21 = arith.constant 0 : index
    %42 = vector.load %arg7[%c0_19, %c0_20, %c0_21] : memref<3x8x128xf32, #tpu.memory_space<vmem>>, vector<1x8x128xf32>
    %43 = vector.shape_cast %42 : vector<1x8x128xf32> to vector<8x128xf32>
    %44 = vector.shape_cast %41 : vector<8x128xf32> to vector<1x8x128xf32>
    tpu.vector_store %arg7[%c0_19, %c0_20, %c0_21], %44 {strides = array<i32>} : memref<3x8x128xf32, #tpu.memory_space<vmem>>, vector<1x8x128xf32>,
    %c1 = arith.constant 1 : index
    %c0_22 = arith.constant 0 : index
    %c0_23 = arith.constant 0 : index
    %45 = vector.load %arg1[%c1, %c0_22, %c0_23] : memref<3x8x128xf32, #tpu.memory_space<vmem>>, vector<1x8x128xf32>
    %46 = vector.shape_cast %45 : vector<1x8x128xf32> to vector<8x128xf32>
    %c0_24 = arith.constant 0 : index
    %c0_25 = arith.constant 0 : index
    %c0_26 = arith.constant 0 : index
    %47 = vector.load %arg3[%c0_24, %c0_25, %c0_26] : memref<2x128x384xf32, #tpu.memory_space<vmem>>, vector<1x128x384xf32>
    %48 = vector.shape_cast %47 : vector<1x128x384xf32> to vector<128x384xf32>
    %cst_27 = arith.constant dense<0.000000e+00> : vector<8x384xf32>
    %49 = tpu.matmul %41, %48, %cst_27 {dimension_numbers = #tpu.dot_dimension_numbers<[1], [0], [0], [1], [0, 0, 1, 1], [], []>} : vector<8x128xf32>, vector<128x384xf32>, vector<8x384xf32> -> vector<8x384xf32>
    %c1_28 = arith.constant 1 : index
    %c0_29 = arith.constant 0 : index
    %c0_30 = arith.constant 0 : index
    %50 = vector.load %arg5[%c1_28, %c0_29, %c0_30] : memref<3x1x384xf32, #tpu.memory_space<vmem>>, vector<1x1x384xf32>
    %51 = vector.shape_cast %50 : vector<1x1x384xf32> to vector<1x384xf32>
    %52 = vector.broadcast %51 : vector<1x384xf32> to vector<8x384xf32>
    %53 = arith.addf %49, %52 : vector<8x384xf32>
    %c1_31 = arith.constant 1 : index
    %c0_32 = arith.constant 0 : index
    %c0_33 = arith.constant 0 : index
    %54 = vector.load %arg4[%c1_31, %c0_32, %c0_33] : memref<3x128x384xf32, #tpu.memory_space<vmem>>, vector<1x128x384xf32>
    %55 = vector.shape_cast %54 : vector<1x128x384xf32> to vector<128x384xf32>
    %cst_34 = arith.constant dense<0.000000e+00> : vector<8x384xf32>
    %56 = tpu.matmul %46, %55, %cst_34 {dimension_numbers = #tpu.dot_dimension_numbers<[1], [0], [0], [1], [0, 0, 1, 1], [], []>} : vector<8x128xf32>, vector<128x384xf32>, vector<8x384xf32> -> vector<8x384xf32>
    %c1_35 = arith.constant 1 : index
    %c0_36 = arith.constant 0 : index
    %c0_37 = arith.constant 0 : index
    %57 = vector.load %arg6[%c1_35, %c0_36, %c0_37] : memref<3x1x128xf32, #tpu.memory_space<vmem>>, vector<1x1x128xf32>
    %58 = vector.shape_cast %57 : vector<1x1x128xf32> to vector<1x128xf32>
    %59 = vector.extract_strided_slice %53 {offsets = [0, 0], sizes = [8, 128], strides = [1, 1]} : vector<8x384xf32> to vector<8x128xf32>
    %60 = vector.extract_strided_slice %56 {offsets = [0, 0], sizes = [8, 128], strides = [1, 1]} : vector<8x384xf32> to vector<8x128xf32>
    %61 = arith.addf %59, %60 : vector<8x128xf32>
    %62 = arith.negf %61 : vector<8x128xf32>
    %63 = math.exp %62 : vector<8x128xf32>
    %cst_38 = arith.constant 1.000000e+00 : f32
    %64 = vector.broadcast %cst_38 : f32 to vector<8x128xf32>
    %65 = arith.addf %64, %63 : vector<8x128xf32>
    %66 = arith.divf %64, %65 : vector<8x128xf32>
    %67 = vector.extract_strided_slice %53 {offsets = [0, 128], sizes = [8, 128], strides = [1, 1]} : vector<8x384xf32> to vector<8x128xf32>
    %68 = vector.extract_strided_slice %56 {offsets = [0, 128], sizes = [8, 128], strides = [1, 1]} : vector<8x384xf32> to vector<8x128xf32>
    %69 = arith.addf %67, %68 : vector<8x128xf32>
    %70 = arith.negf %69 : vector<8x128xf32>
    %71 = math.exp %70 : vector<8x128xf32>
    %cst_39 = arith.constant 1.000000e+00 : f32
    %72 = vector.broadcast %cst_39 : f32 to vector<8x128xf32>
    %73 = arith.addf %72, %71 : vector<8x128xf32>
    %74 = arith.divf %72, %73 : vector<8x128xf32>
    %75 = vector.extract_strided_slice %53 {offsets = [0, 256], sizes = [8, 128], strides = [1, 1]} : vector<8x384xf32> to vector<8x128xf32>
    %76 = vector.extract_strided_slice %56 {offsets = [0, 256], sizes = [8, 128], strides = [1, 1]} : vector<8x384xf32> to vector<8x128xf32>
    %77 = vector.broadcast %58 : vector<1x128xf32> to vector<8x128xf32>
    %78 = arith.addf %76, %77 : vector<8x128xf32>
    %79 = arith.mulf %66, %78 : vector<8x128xf32>
    %80 = arith.addf %75, %79 : vector<8x128xf32>
    %81 = math.tanh %80 : vector<8x128xf32>
    %cst_40 = arith.constant 1.000000e+00 : f32
    %82 = vector.broadcast %cst_40 : f32 to vector<8x128xf32>
    %83 = arith.subf %82, %74 : vector<8x128xf32>
    %84 = arith.mulf %83, %81 : vector<8x128xf32>
    %85 = arith.mulf %74, %46 : vector<8x128xf32>
    %86 = arith.addf %84, %85 : vector<8x128xf32>
    %c1_41 = arith.constant 1 : index
    %c0_42 = arith.constant 0 : index
    %c0_43 = arith.constant 0 : index
    %87 = vector.load %arg7[%c1_41, %c0_42, %c0_43] : memref<3x8x128xf32, #tpu.memory_space<vmem>>, vector<1x8x128xf32>
    %88 = vector.shape_cast %87 : vector<1x8x128xf32> to vector<8x128xf32>
    %89 = vector.shape_cast %86 : vector<8x128xf32> to vector<1x8x128xf32>
    tpu.vector_store %arg7[%c1_41, %c0_42, %c0_43], %89 {strides = array<i32>} : memref<3x8x128xf32, #tpu.memory_space<vmem>>, vector<1x8x128xf32>,
    %c2 = arith.constant 2 : index
    %c0_44 = arith.constant 0 : index
    %c0_45 = arith.constant 0 : index
    %90 = vector.load %arg1[%c2, %c0_44, %c0_45] : memref<3x8x128xf32, #tpu.memory_space<vmem>>, vector<1x8x128xf32>
    %91 = vector.shape_cast %90 : vector<1x8x128xf32> to vector<8x128xf32>
    %c1_46 = arith.constant 1 : index
    %c0_47 = arith.constant 0 : index
    %c0_48 = arith.constant 0 : index
    %92 = vector.load %arg3[%c1_46, %c0_47, %c0_48] : memref<2x128x384xf32, #tpu.memory_space<vmem>>, vector<1x128x384xf32>
    %93 = vector.shape_cast %92 : vector<1x128x384xf32> to vector<128x384xf32>
    %cst_49 = arith.constant dense<0.000000e+00> : vector<8x384xf32>
    %94 = tpu.matmul %86, %93, %cst_49 {dimension_numbers = #tpu.dot_dimension_numbers<[1], [0], [0], [1], [0, 0, 1, 1], [], []>} : vector<8x128xf32>, vector<128x384xf32>, vector<8x384xf32> -> vector<8x384xf32>
    %c2_50 = arith.constant 2 : index
    %c0_51 = arith.constant 0 : index
    %c0_52 = arith.constant 0 : index
    %95 = vector.load %arg5[%c2_50, %c0_51, %c0_52] : memref<3x1x384xf32, #tpu.memory_space<vmem>>, vector<1x1x384xf32>
    %96 = vector.shape_cast %95 : vector<1x1x384xf32> to vector<1x384xf32>
    %97 = vector.broadcast %96 : vector<1x384xf32> to vector<8x384xf32>
    %98 = arith.addf %94, %97 : vector<8x384xf32>
    %c2_53 = arith.constant 2 : index
    %c0_54 = arith.constant 0 : index
    %c0_55 = arith.constant 0 : index
    %99 = vector.load %arg4[%c2_53, %c0_54, %c0_55] : memref<3x128x384xf32, #tpu.memory_space<vmem>>, vector<1x128x384xf32>
    %100 = vector.shape_cast %99 : vector<1x128x384xf32> to vector<128x384xf32>
    %cst_56 = arith.constant dense<0.000000e+00> : vector<8x384xf32>
    %101 = tpu.matmul %91, %100, %cst_56 {dimension_numbers = #tpu.dot_dimension_numbers<[1], [0], [0], [1], [0, 0, 1, 1], [], []>} : vector<8x128xf32>, vector<128x384xf32>, vector<8x384xf32> -> vector<8x384xf32>
    %c2_57 = arith.constant 2 : index
    %c0_58 = arith.constant 0 : index
    %c0_59 = arith.constant 0 : index
    %102 = vector.load %arg6[%c2_57, %c0_58, %c0_59] : memref<3x1x128xf32, #tpu.memory_space<vmem>>, vector<1x1x128xf32>
    %103 = vector.shape_cast %102 : vector<1x1x128xf32> to vector<1x128xf32>
    %104 = vector.extract_strided_slice %98 {offsets = [0, 0], sizes = [8, 128], strides = [1, 1]} : vector<8x384xf32> to vector<8x128xf32>
    %105 = vector.extract_strided_slice %101 {offsets = [0, 0], sizes = [8, 128], strides = [1, 1]} : vector<8x384xf32> to vector<8x128xf32>
    %106 = arith.addf %104, %105 : vector<8x128xf32>
    %107 = arith.negf %106 : vector<8x128xf32>
    %108 = math.exp %107 : vector<8x128xf32>
    %cst_60 = arith.constant 1.000000e+00 : f32
    %109 = vector.broadcast %cst_60 : f32 to vector<8x128xf32>
    %110 = arith.addf %109, %108 : vector<8x128xf32>
    %111 = arith.divf %109, %110 : vector<8x128xf32>
    %112 = vector.extract_strided_slice %98 {offsets = [0, 128], sizes = [8, 128], strides = [1, 1]} : vector<8x384xf32> to vector<8x128xf32>
    %113 = vector.extract_strided_slice %101 {offsets = [0, 128], sizes = [8, 128], strides = [1, 1]} : vector<8x384xf32> to vector<8x128xf32>
    %114 = arith.addf %112, %113 : vector<8x128xf32>
    %115 = arith.negf %114 : vector<8x128xf32>
    %116 = math.exp %115 : vector<8x128xf32>
    %cst_61 = arith.constant 1.000000e+00 : f32
    %117 = vector.broadcast %cst_61 : f32 to vector<8x128xf32>
    %118 = arith.addf %117, %116 : vector<8x128xf32>
    %119 = arith.divf %117, %118 : vector<8x128xf32>
    %120 = vector.extract_strided_slice %98 {offsets = [0, 256], sizes = [8, 128], strides = [1, 1]} : vector<8x384xf32> to vector<8x128xf32>
    %121 = vector.extract_strided_slice %101 {offsets = [0, 256], sizes = [8, 128], strides = [1, 1]} : vector<8x384xf32> to vector<8x128xf32>
    %122 = vector.broadcast %103 : vector<1x128xf32> to vector<8x128xf32>
    %123 = arith.addf %121, %122 : vector<8x128xf32>
    %124 = arith.mulf %111, %123 : vector<8x128xf32>
    %125 = arith.addf %120, %124 : vector<8x128xf32>
    %126 = math.tanh %125 : vector<8x128xf32>
    %cst_62 = arith.constant 1.000000e+00 : f32
    %127 = vector.broadcast %cst_62 : f32 to vector<8x128xf32>
    %128 = arith.subf %127, %119 : vector<8x128xf32>
    %129 = arith.mulf %128, %126 : vector<8x128xf32>
    %130 = arith.mulf %119, %91 : vector<8x128xf32>
    %131 = arith.addf %129, %130 : vector<8x128xf32>
    %c2_63 = arith.constant 2 : index
    %c0_64 = arith.constant 0 : index
    %c0_65 = arith.constant 0 : index
    %132 = vector.load %arg7[%c2_63, %c0_64, %c0_65] : memref<3x8x128xf32, #tpu.memory_space<vmem>>, vector<1x8x128xf32>
    %133 = vector.shape_cast %132 : vector<1x8x128xf32> to vector<8x128xf32>
    %134 = vector.shape_cast %131 : vector<8x128xf32> to vector<1x8x128xf32>
    tpu.vector_store %arg7[%c2_63, %c0_64, %c0_65], %134 {strides = array<i32>} : memref<3x8x128xf32, #tpu.memory_space<vmem>>, vector<1x8x128xf32>,
    return
  }
}

</mosaic_0001>

<bundles_post_ra>
// kernel: tpu_custom_call.1
= control target key start
LH: loop header
LB: loop body
LE: loop exit
PB: predicated region body
PF: predicated region fallthrough
CT: control target
= control target key end

     0   :  { %12 = vsyncpa [#allocation3], 0  ;;  %s2507_s0 = inlined_call_operand.hbm [shape: f32[8,128], index: 0, kind: input, shape index: {}]   ;;  %s2508_s1 = inlined_call_operand.hbm [shape: f32[3,8,128], index: 1, kind: input, shape index: {}]   ;;  %s2509_s2 = inlined_call_operand.hbm [shape: f32[128,384], index: 2, kind: input, shape index: {}]   ;;  %s2510_s3 = inlined_call_operand.hbm [shape: f32[2,128,384], index: 3, kind: input, shape index: {}]   ;;  %s2511_s4 = inlined_call_operand.hbm [shape: f32[3,128,384], index: 4, kind: input, shape index: {}]   ;;  %s2512_s5 = inlined_call_operand.vmem [shape: f32[3,1,384], index: 5, kind: input, shape index: {}]   ;;  %s2513_s6 = inlined_call_operand.vmem [shape: f32[3,1,128], index: 6, kind: input, shape index: {}]   ;;  %s2514_s7 = inlined_call_operand.hbm [shape: f32[3,8,128], index: 7, kind: output, shape index: {}]  }
   0x1   :  { %13 = vsyncpa [#allocation6], 0 }
   0x2   :  { %14 = vsyncpa [#allocation9], 0 }
   0x3   :  { %15 = vsyncpa [#allocation4], 0  ;;  %s2258_s24 = smov [#allocation5]   ;;  %s2118_s28 = scalar_lea.hbm %s2508_s1, 384 }
   0x4   :  { %s31_s25 = sshll.u32 %s2258_s24, 4  ;;  %p2119_p0 = scmp.ne.s32.totalorder %s2508_s1, %s2118_s28  ;;  %s32_s25 = int_to_ptr.vmem [resolvable:$true] %s31_s25 }
   0x5   :  { %p2122_p1 = scmp.lt.u32.totalorder %s2118_s28, %s2508_s1 }
   0x7   :  { %p2124_p2 = pnand %p2122_p1, %p2119_p0 }
   0x9   :  { %2127 = shalt.err (!%p2124_p2)
}
   0xa   :  { %s2128_s10 = scalar_lea.vmem %s32_s25, 384  ;;  %p2133_p4 = scmp.lt.s32.totalorder %s32_s25, %s32_s25 }
   0xb   :  { %p2129_p3 = scmp.ne.s32.totalorder %s32_s25, %s2128_s10  ;;  %p2134_p5 = scmp.lt.s32.totalorder %s2128_s10, %s2128_s10 }
   0xd   :  { %p2135_p6 = por %p2134_p5, %p2133_p4 }
   0xf   :  { %p2136_p7 = pnand %p2135_p6, %p2129_p3 }
  0x11   :  { %2139 = shalt.err (!%p2136_p7)
}
  0x12   :  { %s2259_s11 = smov 128   ;;  %s2260_s12 = smov 8  }
  0x13   :  { %37 = dma.hbm_to_vmem [thread:$0]  %s2508_s1, 384, %s32_s25, [#allocation6], %s2259_s11, %s2259_s11, %s2260_s12  }
  0x14   :  { %s2261_s15 = smov [#allocation8]   ;;  %s2262_s17 = smov [#allocation2]  }
  0x15   :  { %s55_s16 = sshll.u32 %s2261_s15, 4  ;;  %s22_s18 = sshll.u32 %s2262_s17, 4  ;;  %s56_s16 = int_to_ptr.vmem [resolvable:$true] %s55_s16  ;;  %s23_s18 = int_to_ptr.vmem [resolvable:$true] %s22_s18 }
  0x16   :  { %s2140_s21 = scalar_lea.hbm %s2510_s3, 12288 }
  0x17   :  { %p2141_p8 = scmp.ne.s32.totalorder %s2510_s3, %s2140_s21  ;;  %p2144_p9 = scmp.lt.u32.totalorder %s2140_s21, %s2510_s3 }
  0x19   :  { %p2146_p10 = pnand %p2144_p9, %p2141_p8 }
  0x1b   :  { %2149 = shalt.err (!%p2146_p10)
}
  0x1c   :  { %s2150_s1 = scalar_lea.vmem %s56_s16, 12288  ;;  %p2155_p12 = scmp.lt.s32.totalorder %s56_s16, %s56_s16 }
  0x1d   :  { %p2151_p11 = scmp.ne.s32.totalorder %s56_s16, %s2150_s1  ;;  %p2156_p13 = scmp.lt.s32.totalorder %s2150_s1, %s2150_s1 }
  0x1f   :  { %p2157_p0 = por %p2156_p13, %p2155_p12 }
  0x21   :  { %p2158_p1 = pnand %p2157_p0, %p2151_p11 }
  0x23   :  { %2161 = shalt.err (!%p2158_p1)
}
  0x24   :  { %s2263_s25 = smov 384   ;;  %s2264_s27 = smov 24  }
  0x25   :  { %61 = dma.hbm_to_vmem [thread:$0]  %s2510_s3, 12288, %s56_s16, [#allocation9], %s2263_s25, %s2263_s25, %s2264_s27  }
  0x26   :  { %s2162_s9 = scalar_lea.hbm %s2507_s0, 128 }
  0x27   :  { %p2163_p2 = scmp.ne.s32.totalorder %s2507_s0, %s2162_s9  ;;  %p2166_p3 = scmp.lt.u32.totalorder %s2162_s9, %s2507_s0 }
  0x29   :  { %p2168_p4 = pnand %p2166_p3, %p2163_p2 }
  0x2b   :  { %2171 = shalt.err (!%p2168_p4)
}
  0x2c   :  { %s2172_s17 = scalar_lea.vmem %s23_s18, 128  ;;  %p2177_p6 = scmp.lt.s32.totalorder %s23_s18, %s23_s18 }
  0x2d   :  { %p2173_p5 = scmp.ne.s32.totalorder %s23_s18, %s2172_s17  ;;  %p2178_p7 = scmp.lt.s32.totalorder %s2172_s17, %s2172_s17 }
  0x2f   :  { %p2179_p8 = por %p2178_p7, %p2177_p6 }
  0x31   :  { %p2180_p9 = pnand %p2179_p8, %p2173_p5 }
  0x33   :  { %2183 = shalt.err (!%p2180_p9)
}
  0x34   :  { %25 = dma.hbm_to_vmem [thread:$0]  %s2507_s0, 128, %s23_s18, [#allocation3]  }
  0x35   :  { %s2265_s19 = smov [#allocation7]   ;;  %s2266_s21 = smov [#allocation10]  }
  0x36   :  { %s43_s20 = sshll.u32 %s2265_s19, 4  ;;  %s67_s22 = sshll.u32 %s2266_s21, 4  ;;  %s44_s20 = int_to_ptr.vmem [resolvable:$true] %s43_s20  ;;  %s68_s22 = int_to_ptr.vmem [resolvable:$true] %s67_s22 }
  0x37   :  { %s2184_s26 = scalar_lea.hbm %s2509_s2, 6144 }
  0x38   :  { %p2185_p10 = scmp.ne.s32.totalorder %s2509_s2, %s2184_s26  ;;  %p2188_p11 = scmp.lt.u32.totalorder %s2184_s26, %s2509_s2 }
  0x3a   :  { %p2190_p12 = pnand %p2188_p11, %p2185_p10 }
  0x3c   :  { %2193 = shalt.err (!%p2190_p12)
}
  0x3d   :  { %s2194_s0 = scalar_lea.vmem %s44_s20, 6144  ;;  %p2199_p0 = scmp.lt.s32.totalorder %s44_s20, %s44_s20 }
  0x3e   :  { %p2195_p13 = scmp.ne.s32.totalorder %s44_s20, %s2194_s0  ;;  %p2200_p1 = scmp.lt.s32.totalorder %s2194_s0, %s2194_s0 }
  0x40   :  { %p2201_p2 = por %p2200_p1, %p2199_p0 }
  0x42   :  { %p2202_p3 = pnand %p2201_p2, %p2195_p13 }
  0x44   :  { %2205 = shalt.err (!%p2202_p3)
}
  0x45   :  { %49 = dma.hbm_to_vmem [thread:$0]  %s2509_s2, 6144, %s44_s20, [#allocation6], %s2263_s25, %s2263_s25, %s2264_s27  }
  0x46   :  { %s2206_s13 = scalar_lea.hbm %s2511_s4, 18432 }
  0x47   :  { %p2207_p4 = scmp.ne.s32.totalorder %s2511_s4, %s2206_s13  ;;  %p2210_p5 = scmp.lt.u32.totalorder %s2206_s13, %s2511_s4 }
  0x49   :  { %p2212_p6 = pnand %p2210_p5, %p2207_p4 }
  0x4b   :  { %2215 = shalt.err (!%p2212_p6)
}
  0x4c   :  { %s2216_s16 = scalar_lea.vmem %s68_s22, 18432  ;;  %p2221_p8 = scmp.lt.s32.totalorder %s68_s22, %s68_s22 }
  0x4d   :  { %p2217_p7 = scmp.ne.s32.totalorder %s68_s22, %s2216_s16  ;;  %p2222_p9 = scmp.lt.s32.totalorder %s2216_s16, %s2216_s16 }
  0x4f   :  { %p2223_p10 = por %p2222_p9, %p2221_p8 }
  0x51   :  { %p2224_p11 = pnand %p2223_p10, %p2217_p7 }
  0x53   :  { %2227 = shalt.err (!%p2224_p11)
}
  0x54   :  { %73 = dma.hbm_to_vmem [thread:$0]  %s2511_s4, 18432, %s68_s22, [#allocation9], %s2263_s25, %s2263_s25, %s2264_s27  }
  0x55   :  { %2250 = dma.done.wait [#allocation3], 128  }
  0x56   :  { %2251 = vsyncadd [#allocation3], 4294967168 }
  0x57   :  { %2252 = dma.done.wait [#allocation6], 6528  }
  0x58   :  { %2253 = vsyncadd [#allocation6], 4294960768 }
  0x59   :  { %2254 = dma.done.wait [#allocation9], 30720  }
  0x5a   :  { %2255 = vsyncadd [#allocation9], 4294936576  ;;  %v2267_v0 = vmov 0.0|0.0   ;;  %v2268_v1 = vmov 0.0   ;;  %vm2269_vm0 = vmmov 0   ;;  %v96_v2 = vld [vmem:[#allocation7 + $0x8] sm:$0xff] }
  0x5b   :  { %1759 = vmatprep.subr.bf16.mxu1 %v2267_v0  ;;  %224 = vmatprep.mubr.f32.mxu0 %v2268_v1  ;;  %v99_v3 = vld [vmem:[#allocation7 + $0x20] sm:$0xff]  ;;  %v98_v6 = vld [vmem:[#allocation7 + $0x18] sm:$0xff]  ;;  %v105_v8 = vld [vmem:[#allocation7 + $0x50] sm:$0xff]  ;;  %s2270_s29 = smov [#allocation11]  }
  0x5c   :  { %1549 = vmatprep.mubr.msk.f32.mxu1 %vm2269_vm0, %v2268_v1  ;;  %v95_v4 = vld [vmem:[#allocation7] sm:$0xff]  ;;  %v1727_v5 = vpack.c.bf16 %v99_v3, %v96_v2  ;;  %v102_v7 = vld [vmem:[#allocation7 + $0x38] sm:$0xff]  ;;  %v101_v11 = vld [vmem:[#allocation7 + $0x30] sm:$0xff]  ;;  %s1388_s30 = sshll.u32 %s2270_s29, 4  ;;  %s1389_s30 = int_to_ptr.vmem [resolvable:$true] %s1388_s30 }
  0x5d   :  { %v1729_v9 = vpack.c.bf16 %v98_v6, %v95_v4  ;;  %v1731_v10 = vpack.c.bf16 %v105_v8, %v102_v7  ;;  %v104_v12 = vld [vmem:[#allocation7 + $0x48] sm:$0xff]  ;;  %v111_v14 = vld [vmem:[#allocation7 + $0x80] sm:$0xff]  ;;  %v110_v18 = vld [vmem:[#allocation7 + $0x78] sm:$0xff]  ;;  %p2233_p13 = scmp.lt.s32.totalorder %s1389_s30, %s1389_s30 }
  0x5e   :  { %v108_v13 = vld [vmem:[#allocation7 + $0x68] sm:$0xff]  ;;  %1728 = vmatprep.subr.bf16.mxu0 %v1727_v5  ;;  %v1733_v15 = vpack.c.bf16 %v104_v12, %v101_v11  ;;  %v107_v17 = vld [vmem:[#allocation7 + $0x60] sm:$0xff]  ;;  %v114_v19 = vld [vmem:[#allocation7 + $0x98] sm:$0xff] }
  0x5f   :  { %1730 = vmatpush1.bf16.msra.mxu0 %v1729_v9  ;;  %v1735_v16 = vpack.c.bf16 %v111_v14, %v108_v13  ;;  %v117_v20 = vld [vmem:[#allocation7 + $0xb0] sm:$0xff]  ;;  %v1737_v21 = vpack.c.bf16 %v110_v18, %v107_v17  ;;  %v116_v24 = vld [vmem:[#allocation7 + $0xa8] sm:$0xff]  ;;  %v123_v28 = vld [vmem:[#allocation7 + $0xe0] sm:$0xff] }
  0x60   :  { %1732 = vmatprep.subr.bf16.mxu0 %v1731_v10  ;;  %v113_v22 = vld [vmem:[#allocation7 + $0x90] sm:$0xff]  ;;  %v1739_v23 = vpack.c.bf16 %v117_v20, %v114_v19  ;;  %v100_v26 = vld [vmem:[#allocation7 + $0x28] sm:$0xff]  ;;  %v103_v30 = vld [vmem:[#allocation7 + $0x40] sm:$0xff] }
  0x61   :  { %v97_v25 = vld [vmem:[#allocation7 + $0x10] sm:$0xff]  ;;  %v120_v27 = vld [vmem:[#allocation7 + $0xc8] sm:$0xff]  ;;  %v106_v31 = vld [vmem:[#allocation7 + $0x58] sm:$0xff]  ;;  %v1741_v32 = vpack.c.bf16 %v116_v24, %v113_v22 }
  0x62   :  { %v1760_v29 = vpack.c.bf16 %v100_v26, %v97_v25  ;;  %v1763_v33 = vpack.c.bf16 %v106_v31, %v103_v30  ;;  %v1743_v34 = vpack.c.bf16 %v123_v28, %v120_v27  ;;  %v119_v35 = vld [vmem:[#allocation7 + $0xc0] sm:$0xff]  ;;  %v122_v36 = vld [vmem:[#allocation7 + $0xd8] sm:$0xff]  ;;  %v109_v37 = vld [vmem:[#allocation7 + $0x70] sm:$0xff] }
  0x63   :  { %1734 = vmatpush1.bf16.msra.mxu0 %v1733_v15  ;;  %v126_v38 = vld [vmem:[#allocation7 + $0xf8] sm:$0xff]  ;;  %v129_v39 = vld [vmem:[#allocation7 + $0x110] sm:$0xff]  ;;  %v112_v40 = vld [vmem:[#allocation7 + $0x88] sm:$0xff]  ;;  %v1745_v41 = vpack.c.bf16 %v122_v36, %v119_v35 }
  0x64   :  { %1736 = vmatprep.subr.bf16.mxu0 %v1735_v16  ;;  %1761 = vmatpush3.bf16.msra.mxu1 %v1760_v29  ;;  %v125_v42 = vld [vmem:[#allocation7 + $0xf0] sm:$0xff]  ;;  %v1766_v43 = vpack.c.bf16 %v112_v40, %v109_v37  ;;  %v1747_v44 = vpack.c.bf16 %v129_v39, %v126_v38  ;;  %v128_v45 = vld [vmem:[#allocation7 + $0x108] sm:$0xff]  ;;  %v115_v46 = vld [vmem:[#allocation7 + $0xa0] sm:$0xff] }
  0x65   :  { %1762 = vmatprep.subr.bf16.mxu1 %v2267_v0  ;;  %v118_v47 = vld [vmem:[#allocation7 + $0xb8] sm:$0xff]  ;;  %v132_v48 = vld [vmem:[#allocation7 + $0x128] sm:$0xff]  ;;  %v135_v49 = vld [vmem:[#allocation7 + $0x140] sm:$0xff]  ;;  %v1749_v50 = vpack.c.bf16 %v128_v45, %v125_v42 }
  0x66   :  { %v131_v51 = vld [vmem:[#allocation7 + $0x120] sm:$0xff]  ;;  %v1769_v52 = vpack.c.bf16 %v118_v47, %v115_v46  ;;  %v1751_v53 = vpack.c.bf16 %v135_v49, %v132_v48  ;;  %v134_v54 = vld [vmem:[#allocation7 + $0x138] sm:$0xff]  ;;  %v121_v55 = vld [vmem:[#allocation7 + $0xd0] sm:$0xff] }
  0x67   :  { %1738 = vmatpush1.bf16.msra.mxu0 %v1737_v21  ;;  %v124_v56 = vld [vmem:[#allocation7 + $0xe8] sm:$0xff]  ;;  %v138_v57 = vld [vmem:[#allocation7 + $0x158] sm:$0xff]  ;;  %v141_v58 = vld [vmem:[#allocation7 + $0x170] sm:$0xff]  ;;  %v1753_v59 = vpack.c.bf16 %v134_v54, %v131_v51 }
  0x68   :  { %1740 = vmatprep.subr.bf16.mxu0 %v1739_v23  ;;  %1764 = vmatpush3.bf16.msra.mxu1 %v1763_v33  ;;  %v137_v60 = vld [vmem:[#allocation7 + $0x150] sm:$0xff]  ;;  %v1772_v61 = vpack.c.bf16 %v124_v56, %v121_v55  ;;  %v1755_v62 = vpack.c.bf16 %v141_v58, %v138_v57  ;;  %v140_v63 = vld [vmem:[#allocation7 + $0x168] sm:$0xff]  ;;  %v127_v2 = vld [vmem:[#allocation7 + $0x100] sm:$0xff] }
  0x69   :  { %1765 = vmatprep.subr.bf16.mxu1 %v2267_v0  ;;  %v130_v3 = vld [vmem:[#allocation7 + $0x118] sm:$0xff]  ;;  %v302_v4 = vld [vmem:[#allocation10 + $0x8] sm:$0xff]  ;;  %v305_v5 = vld [vmem:[#allocation10 + $0x20] sm:$0xff]  ;;  %v1757_v6 = vpack.c.bf16 %v140_v63, %v137_v60 }
  0x6a   :  { %v301_v7 = vld [vmem:[#allocation10] sm:$0xff]  ;;  %v1775_v8 = vpack.c.bf16 %v130_v3, %v127_v2  ;;  %v1783_v9 = vpack.c.bf16 %v305_v5, %v302_v4  ;;  %v304_v10 = vld [vmem:[#allocation10 + $0x18] sm:$0xff]  ;;  %v133_v11 = vld [vmem:[#allocation7 + $0x130] sm:$0xff] }
  0x6b   :  { %1742 = vmatpush1.bf16.msra.mxu0 %v1741_v32  ;;  %v136_v12 = vld [vmem:[#allocation7 + $0x148] sm:$0xff]  ;;  %v308_v13 = vld [vmem:[#allocation10 + $0x38] sm:$0xff]  ;;  %v311_v14 = vld [vmem:[#allocation10 + $0x50] sm:$0xff]  ;;  %v1785_v16 = vpack.c.bf16 %v304_v10, %v301_v7 }
  0x6c   :  { %1744 = vmatprep.subr.bf16.mxu0 %v1743_v34  ;;  %1767 = vmatpush3.bf16.msra.mxu1 %v1766_v43  ;;  %v93_v15 = vld [vmem:[#allocation2] sm:$0xff]  ;;  %v307_v17 = vld [vmem:[#allocation10 + $0x30] sm:$0xff]  ;;  %v1778_v18 = vpack.c.bf16 %v136_v12, %v133_v11  ;;  %v1787_v19 = vpack.c.bf16 %v311_v14, %v308_v13  ;;  %v310_v20 = vld [vmem:[#allocation10 + $0x48] sm:$0xff] }
  0x6d   :  { %1768 = vmatprep.subr.bf16.mxu1 %v2267_v0  ;;  %v139_v21 = vld [vmem:[#allocation7 + $0x160] sm:$0xff]  ;;  %v142_v22 = vld [vmem:[#allocation7 + $0x178] sm:$0xff]  ;;  %v314_v23 = vld [vmem:[#allocation10 + $0x68] sm:$0xff]  ;;  %v1789_v25 = vpack.c.bf16 %v310_v20, %v307_v17 }
  0x6e   :  { %v317_v24 = vld [vmem:[#allocation10 + $0x80] sm:$0xff]  ;;  %v1781_v27 = vpack.c.bf16 %v142_v22, %v139_v21  ;;  %v316_v29 = vld [vmem:[#allocation10 + $0x78] sm:$0xff]  ;;  %v303_v30 = vld [vmem:[#allocation10 + $0x10] sm:$0xff] }
  0x6f   :  { %1746 = vmatpush1.bf16.msra.mxu0 %v1745_v41  ;;  %v313_v26 = vld [vmem:[#allocation10 + $0x60] sm:$0xff]  ;;  %v1791_v28 = vpack.c.bf16 %v317_v24, %v314_v23  ;;  %v306_v31 = vld [vmem:[#allocation10 + $0x28] sm:$0xff]  ;;  %v320_v32 = vld [vmem:[#allocation10 + $0x98] sm:$0xff] }
  0x70   :  { %1748 = vmatprep.subr.bf16.mxu0 %v1747_v44  ;;  %1770 = vmatpush3.bf16.msra.mxu1 %v1769_v52  ;;  %v323_v33 = vld [vmem:[#allocation10 + $0xb0] sm:$0xff]  ;;  %v1793_v34 = vpack.c.bf16 %v316_v29, %v313_v26  ;;  %v1816_v36 = vpack.c.bf16 %v306_v31, %v303_v30  ;;  %v322_v38 = vld [vmem:[#allocation10 + $0xa8] sm:$0xff]  ;;  %v309_v39 = vld [vmem:[#allocation10 + $0x40] sm:$0xff] }
  0x71   :  { %1771 = vmatprep.subr.bf16.mxu1 %v2267_v0  ;;  %v319_v35 = vld [vmem:[#allocation10 + $0x90] sm:$0xff]  ;;  %v1795_v37 = vpack.c.bf16 %v323_v33, %v320_v32  ;;  %v312_v40 = vld [vmem:[#allocation10 + $0x58] sm:$0xff]  ;;  %v326_v41 = vld [vmem:[#allocation10 + $0xc8] sm:$0xff] }
  0x72   :  { %v329_v42 = vld [vmem:[#allocation10 + $0xe0] sm:$0xff]  ;;  %v1797_v43 = vpack.c.bf16 %v322_v38, %v319_v35  ;;  %v1819_v45 = vpack.c.bf16 %v312_v40, %v309_v39  ;;  %v328_v47 = vld [vmem:[#allocation10 + $0xd8] sm:$0xff]  ;;  %v315_v48 = vld [vmem:[#allocation10 + $0x70] sm:$0xff] }
  0x73   :  { %1750 = vmatpush1.bf16.msra.mxu0 %v1749_v50  ;;  %v325_v44 = vld [vmem:[#allocation10 + $0xc0] sm:$0xff]  ;;  %v1799_v46 = vpack.c.bf16 %v329_v42, %v326_v41  ;;  %v318_v49 = vld [vmem:[#allocation10 + $0x88] sm:$0xff]  ;;  %v332_v50 = vld [vmem:[#allocation10 + $0xf8] sm:$0xff] }
  0x74   :  { %1752 = vmatprep.subr.bf16.mxu0 %v1751_v53  ;;  %1773 = vmatpush3.bf16.msra.mxu1 %v1772_v61  ;;  %v335_v51 = vld [vmem:[#allocation10 + $0x110] sm:$0xff]  ;;  %v1801_v52 = vpack.c.bf16 %v328_v47, %v325_v44  ;;  %v1822_v54 = vpack.c.bf16 %v318_v49, %v315_v48  ;;  %v334_v56 = vld [vmem:[#allocation10 + $0x108] sm:$0xff]  ;;  %v321_v57 = vld [vmem:[#allocation10 + $0xa0] sm:$0xff] }
  0x75   :  { %1774 = vmatprep.subr.bf16.mxu1 %v2267_v0  ;;  %v331_v53 = vld [vmem:[#allocation10 + $0xf0] sm:$0xff]  ;;  %v1803_v55 = vpack.c.bf16 %v335_v51, %v332_v50  ;;  %v324_v58 = vld [vmem:[#allocation10 + $0xb8] sm:$0xff]  ;;  %v341_v60 = vld [vmem:[#allocation10 + $0x140] sm:$0xff] }
  0x76   :  { %v1805_v61 = vpack.c.bf16 %v334_v56, %v331_v53  ;;  %v1825_v63 = vpack.c.bf16 %v324_v58, %v321_v57  ;;  %v340_v3 = vld [vmem:[#allocation10 + $0x138] sm:$0xff]  ;;  %v327_v4 = vld [vmem:[#allocation10 + $0xd0] sm:$0xff]  ;;  %v330_v5 = vld [vmem:[#allocation10 + $0xe8] sm:$0xff] }
  0x77   :  { %1754 = vmatpush1.bf16.msra.mxu0 %v1753_v59  ;;  %v338_v59 = vld [vmem:[#allocation10 + $0x128] sm:$0xff]  ;;  %v347_v7 = vld [vmem:[#allocation10 + $0x170] sm:$0xff]  ;;  %v1828_v10 = vpack.c.bf16 %v330_v5, %v327_v4  ;;  %v333_v13 = vld [vmem:[#allocation10 + $0x100] sm:$0xff] }
  0x78   :  { %1756 = vmatprep.subr.bf16.mxu0 %v1755_v62  ;;  %1776 = vmatpush3.bf16.msra.mxu1 %v1775_v8  ;;  %v337_v62 = vld [vmem:[#allocation10 + $0x120] sm:$0xff]  ;;  %v1807_v2 = vpack.c.bf16 %v341_v60, %v338_v59  ;;  %v346_v12 = vld [vmem:[#allocation10 + $0x168] sm:$0xff]  ;;  %v336_v14 = vld [vmem:[#allocation10 + $0x118] sm:$0xff] }
  0x79   :  { %1777 = vmatprep.subr.bf16.mxu1 %v2267_v0  ;;  %v1809_v8 = vpack.c.bf16 %v340_v3, %v337_v62  ;;  %v339_v17 = vld [vmem:[#allocation10 + $0x130] sm:$0xff]  ;;  %v345_v21 = vld [vmem:[#allocation10 + $0x160] sm:$0xff]  ;;  %v348_v22 = vld [vmem:[#allocation10 + $0x178] sm:$0xff] }
  0x7a   :  { %v1837_v23 = vpack.c.bf16 %v348_v22, %v345_v21  ;;  %v523_v24 = vld [vmem:[#allocation8 + $0x8] sm:$0xff]  ;;  %v524_v30 = vld [vmem:[#allocation8 + $0x10] sm:$0xff]  ;;  %v529_v33 = vld [vmem:[#allocation8 + $0x38] sm:$0xff] }
  0x7b   :  { %1758 = vmatpush1.bf16.msra.mxu0 %v1757_v6  ;;  %v344_v6 = vld [vmem:[#allocation10 + $0x158] sm:$0xff]  ;;  %v527_v31 = vld [vmem:[#allocation8 + $0x28] sm:$0xff]  ;;  %v530_v39 = vld [vmem:[#allocation8 + $0x40] sm:$0xff] }
  0x7c   :  { %1784 = vmatprep.subr.bf16.mxu0 %v1783_v9  ;;  %1779 = vmatpush3.bf16.msra.mxu1 %v1778_v18  ;;  %v343_v9 = vld [vmem:[#allocation10 + $0x150] sm:$0xff]  ;;  %v1811_v11 = vpack.c.bf16 %v347_v7, %v344_v6  ;;  %v342_v18 = vld [vmem:[#allocation10 + $0x148] sm:$0xff]  ;;  %v1872_v32 = vpack.c.bf16 %v527_v31, %v524_v30  ;;  %v533_v40 = vld [vmem:[#allocation8 + $0x58] sm:$0xff] }
  0x7d   :  { %1780 = vmatprep.subr.bf16.mxu1 %v2267_v0  ;;  %v1834_v20 = vpack.c.bf16 %v342_v18, %v339_v17  ;;  %v1875_v41 = vpack.c.bf16 %v533_v40, %v530_v39  ;;  %v535_v42 = vld [vmem:[#allocation8 + $0x68] sm:$0xff]  ;;  %v534_v44 = vld [vmem:[#allocation8 + $0x60] sm:$0xff]  ;;  %v536_v48 = vld [vmem:[#allocation8 + $0x70] sm:$0xff]  ;;  %v145_v40 = vlaneseq }
  0x7e   :  { %225 = vmatmul.mubr.f32.vlgmr.msra.gmra.mrb[0].mxu0 %v93_v15  ;;  %v539_v49 = vld [vmem:[#allocation8 + $0x88] sm:$0xff]  ;;  %v541_v51 = vld [vmem:[#allocation8 + $0x98] sm:$0xff]  ;;  %v542_v57 = vld [vmem:[#allocation8 + $0xa0] sm:$0xff] }
  0x7f   :  { %1786 = vmatpush1.bf16.msra.mxu0 %v1785_v16  ;;  %413 = vmatprep.mubr.f32.mxu0 %v2268_v1  ;;  %v1831_v16 = vpack.c.bf16 %v336_v14, %v333_v13  ;;  %v1878_v50 = vpack.c.bf16 %v539_v49, %v536_v48  ;;  %v545_v58 = vld [vmem:[#allocation8 + $0xb8] sm:$0xff]  ;;  %v547_v60 = vld [vmem:[#allocation8 + $0xc8] sm:$0xff]  ;;  %v548_v4 = vld [vmem:[#allocation8 + $0xd0] sm:$0xff] }
  0x80   :  { %1788 = vmatprep.subr.bf16.mxu0 %v1787_v19  ;;  %1782 = vmatpush3.bf16.msra.mxu1 %v1781_v27  ;;  %v2403_v19 = vld [vmem:[#allocation5] sm:$0xff]  ;;  %v522_v27 = vld [vmem:[#allocation8] sm:$0xff]  ;;  %v1881_v59 = vpack.c.bf16 %v545_v58, %v542_v57  ;;  %v553_v7 = vld [vmem:[#allocation8 + $0xf8] sm:$0xff] }
  0x81   :  { %1815 = vmatprep.subr.bf16.mxu1 %v2267_v0  ;;  %v551_v5 = vld [vmem:[#allocation8 + $0xe8] sm:$0xff]  ;;  %v557_v14 = vld [vmem:[#allocation8 + $0x118] sm:$0xff]  ;;  %v560_v22 = vld [vmem:[#allocation8 + $0x130] sm:$0xff] }
  0x82   :  { %v1884_v6 = vpack.c.bf16 %v551_v5, %v548_v4  ;;  %v561_v21 = vld [vmem:[#allocation8 + $0x138] sm:$0xff]  ;;  %v567_v30 = vld [vmem:[#allocation8 + $0x168] sm:$0xff]  ;;  %v566_v31 = vld [vmem:[#allocation8 + $0x160] sm:$0xff] }
  0x83   :  { %1790 = vmatpush1.bf16.msra.mxu0 %v1789_v25  ;;  %1550 = vmatmul.mubr.f32.vlgmr.msra.gmra.mrb[0].mxu1 %v93_v15  ;;  %v1813_v15 = vpack.c.bf16 %v346_v12, %v343_v9  ;;  %v526_v25 = vld [vmem:[#allocation8 + $0x20] sm:$0xff] }
  0x84   :  { %1792 = vmatprep.subr.bf16.mxu0 %v1791_v28  ;;  %1817 = vmatpush3.bf16.msra.mxu1 %v1816_v36  ;;  %v1839_v26 = vpack.c.bf16 %v526_v25, %v523_v24  ;;  %v525_v28 = vld [vmem:[#allocation8 + $0x18] sm:$0xff]  ;;  %v528_v36 = vld [vmem:[#allocation8 + $0x30] sm:$0xff]  ;;  %v554_v12 = vld [vmem:[#allocation8 + $0x100] sm:$0xff] }
  0x85   :  { %1818 = vmatprep.subr.bf16.mxu1 %v2267_v0  ;;  %1584 = vmatprep.mubr.msk.f32.mxu1 %vm2269_vm0, %v2268_v1  ;;  %v1841_v29 = vpack.c.bf16 %v525_v28, %v522_v27  ;;  %v1887_v17 = vpack.c.bf16 %v557_v14, %v554_v12  ;;  %v563_v24 = vld [vmem:[#allocation8 + $0x148] sm:$0xff]  ;;  %v565_v25 = vld [vmem:[#allocation8 + $0x158] sm:$0xff] }
  0x86   :  { %v1890_v27 = vpack.c.bf16 %v563_v24, %v560_v22  ;;  %v737_v12 = vld [vmem:[#allocation10 + $0x1b8] sm:$0xff]  ;;  %v739_v22 = vld [vmem:[#allocation10 + $0x1c8] sm:$0xff] }
  0x87   :  { %1794 = vmatpush1.bf16.msra.mxu0 %v1793_v34  ;;  %v532_v34 = vld [vmem:[#allocation8 + $0x50] sm:$0xff]  ;;  %v741_v24 = vld [vmem:[#allocation10 + $0x1d8] sm:$0xff] }
  0x88   :  { %1796 = vmatprep.subr.bf16.mxu0 %v1795_v37  ;;  %1820 = vmatpush3.bf16.msra.mxu1 %v1819_v45  ;;  %v1843_v35 = vpack.c.bf16 %v532_v34, %v529_v33  ;;  %v531_v37 = vld [vmem:[#allocation8 + $0x48] sm:$0xff]  ;;  %v734_v34 = vld [vmem:[#allocation10 + $0x1a0] sm:$0xff] }
  0x89   :  { %1821 = vmatprep.subr.bf16.mxu1 %v2267_v0  ;;  %v1845_v38 = vpack.c.bf16 %v531_v37, %v528_v36  ;;  %v731_v33 = vld [vmem:[#allocation10 + $0x188] sm:$0xff] }
  0x8a   :  { %v1895_v37 = vpack.c.bf16 %v734_v34, %v731_v33  ;;  %v749_v33 = vld [vmem:[#allocation10 + $0x218] sm:$0xff]  ;;  %v752_v34 = vld [vmem:[#allocation10 + $0x230] sm:$0xff] }
  0x8b   :  { %1798 = vmatpush1.bf16.msra.mxu0 %v1797_v43  ;;  %v538_v43 = vld [vmem:[#allocation8 + $0x80] sm:$0xff] }
  0x8c   :  { %1800 = vmatprep.subr.bf16.mxu0 %v1799_v46  ;;  %1823 = vmatpush3.bf16.msra.mxu1 %v1822_v54  ;;  %v1847_v45 = vpack.c.bf16 %v538_v43, %v535_v42  ;;  %v537_v46 = vld [vmem:[#allocation8 + $0x78] sm:$0xff]  ;;  %v540_v54 = vld [vmem:[#allocation8 + $0x90] sm:$0xff] }
  0x8d   :  { %1824 = vmatprep.subr.bf16.mxu1 %v2267_v0  ;;  %v1849_v47 = vpack.c.bf16 %v537_v46, %v534_v44  ;;  %v143_v43 = vld [vmem:[%s2512_s5] sm:$0x7] }
  0x8f   :  { %1802 = vmatpush1.bf16.msra.mxu0 %v1801_v52  ;;  %v544_v52 = vld [vmem:[#allocation8 + $0xb0] sm:$0xff] }
  0x90   :  { %1804 = vmatprep.subr.bf16.mxu0 %v1803_v55  ;;  %1826 = vmatpush3.bf16.msra.mxu1 %v1825_v63  ;;  %v1851_v53 = vpack.c.bf16 %v544_v52, %v541_v51  ;;  %v543_v55 = vld [vmem:[#allocation8 + $0xa8] sm:$0xff]  ;;  %v546_v63 = vld [vmem:[#allocation8 + $0xc0] sm:$0xff] }
  0x91   :  { %1827 = vmatprep.subr.bf16.mxu1 %v2267_v0  ;;  %v1853_v56 = vpack.c.bf16 %v543_v55, %v540_v54 }
  0x93   :  { %1806 = vmatpush1.bf16.msra.mxu0 %v1805_v61  ;;  %v550_v61 = vld [vmem:[#allocation8 + $0xe0] sm:$0xff] }
  0x94   :  { %1808 = vmatprep.subr.bf16.mxu0 %v1807_v2  ;;  %1829 = vmatpush3.bf16.msra.mxu1 %v1828_v10  ;;  %v1855_v62 = vpack.c.bf16 %v550_v61, %v547_v60  ;;  %v549_v2 = vld [vmem:[#allocation8 + $0xd8] sm:$0xff]  ;;  %v552_v10 = vld [vmem:[#allocation8 + $0xf0] sm:$0xff] }
  0x95   :  { %1830 = vmatprep.subr.bf16.mxu1 %v2267_v0  ;;  %v1857_v3 = vpack.c.bf16 %v549_v2, %v546_v63 }
  0x97   :  { %1810 = vmatpush1.bf16.msra.mxu0 %v1809_v8  ;;  %v556_v8 = vld [vmem:[#allocation8 + $0x110] sm:$0xff] }
  0x98   :  { %1812 = vmatprep.subr.bf16.mxu0 %v1811_v11  ;;  %1832 = vmatpush3.bf16.msra.mxu1 %v1831_v16  ;;  %v1859_v9 = vpack.c.bf16 %v556_v8, %v553_v7  ;;  %v555_v11 = vld [vmem:[#allocation8 + $0x108] sm:$0xff]  ;;  %v562_v16 = vld [vmem:[#allocation8 + $0x140] sm:$0xff]  ;;  %v733_v8 = vld [vmem:[#allocation10 + $0x198] sm:$0xff] }
  0x99   :  { %1833 = vmatprep.subr.bf16.mxu1 %v2267_v0  ;;  %v1861_v13 = vpack.c.bf16 %v555_v11, %v552_v10  ;;  %v735_v10 = vld [vmem:[#allocation10 + $0x1a8] sm:$0xff] }
  0x9b   :  { %1814 = vmatpush1.bf16.msra.mxu0 %v1813_v15  ;;  %v559_v15 = vld [vmem:[#allocation8 + $0x128] sm:$0xff] }
  0x9c   :  { %1835 = vmatpush3.bf16.msra.mxu1 %v1834_v20  ;;  %1840 = vmatprep.subr.bf16.mxu0 %v1839_v26  ;;  %v1863_v18 = vpack.c.bf16 %v562_v16, %v559_v15  ;;  %v558_v20 = vld [vmem:[#allocation8 + $0x120] sm:$0xff]  ;;  %v568_v26 = vld [vmem:[#allocation8 + $0x170] sm:$0xff] }
  0x9d   :  { %1836 = vmatprep.subr.bf16.mxu1 %v2267_v0  ;;  %v1867_v28 = vpack.c.bf16 %v568_v26, %v565_v25  ;;  %v743_v25 = vld [vmem:[#allocation10 + $0x1e8] sm:$0xff]  ;;  %v746_v26 = vld [vmem:[#allocation10 + $0x200] sm:$0xff] }
  0x9e   :  { %414 = vmatmul.mubr.f32.vlgmr.msra.gmra.mrb[0].mxu0 %v2403_v19 }
  0x9f   :  { %652 = vmatprep.mubr.f32.mxu0 %v2268_v1  ;;  %1842 = vmatpush1.bf16.msra.mxu0 %v1841_v29  ;;  %v564_v29 = vld [vmem:[#allocation8 + $0x150] sm:$0xff] }
  0xa0   :  { %1838 = vmatpush3.bf16.msra.mxu1 %v1837_v23  ;;  %1844 = vmatprep.subr.bf16.mxu0 %v1843_v35  ;;  %v1865_v23 = vpack.c.bf16 %v561_v21, %v558_v20  ;;  %v1869_v35 = vpack.c.bf16 %v567_v30, %v564_v29  ;;  %v745_v30 = vld [vmem:[#allocation10 + $0x1f8] sm:$0xff] }
  0xa1   :  { %1871 = vmatprep.subr.bf16.mxu1 %v2267_v0 }
  0xa3   :  { %1585 = vmatmul.mubr.f32.vlgmr.msra.gmra.mrb[2].mxu1 %v2403_v19  ;;  %1846 = vmatpush1.bf16.msra.mxu0 %v1845_v38 }
  0xa4   :  { %1619 = vmatprep.mubr.msk.f32.mxu1 %vm2269_vm0, %v2268_v1  ;;  %1873 = vmatpush3.bf16.msra.mxu1 %v1872_v32  ;;  %v569_v32 = vld [vmem:[#allocation8 + $0x178] sm:$0xff] }
  0xa5   :  { %1874 = vmatprep.subr.bf16.mxu1 %v2267_v0  ;;  %1848 = vmatprep.subr.bf16.mxu0 %v1847_v45  ;;  %v1893_v36 = vpack.c.bf16 %v569_v32, %v566_v31  ;;  %v744_v31 = vld [vmem:[#allocation10 + $0x1f0] sm:$0xff]  ;;  %v747_v32 = vld [vmem:[#allocation10 + $0x208] sm:$0xff] }
  0xa7   :  { %1850 = vmatpush1.bf16.msra.mxu0 %v1849_v47 }
  0xa8   :  { %1876 = vmatpush3.bf16.msra.mxu1 %v1875_v41  ;;  %1852 = vmatprep.subr.bf16.mxu0 %v1851_v53  ;;  %v146_v41 = vshrl.u32 %v145_v40, 7  ;;  %v750_v40 = vld [vmem:[#allocation10 + $0x220] sm:$0xff] }
  0xa9   :  { %1877 = vmatprep.subr.bf16.mxu1 %v2267_v0 }
  0xaa   :  { %v2421_v42 = vsub.s32 0, %v146_v41  ;;  %v2426_v44 = vsub.s32 1, %v146_v41  ;;  %v2430_v57 = vsub.s32 2, %v146_v41  ;;  %v753_v41 = vld [vmem:[#allocation10 + $0x238] sm:$0xff] }
  0xab   :  { %1854 = vmatpush1.bf16.msra.mxu0 %v1853_v56 }
  0xac   :  { %1879 = vmatpush3.bf16.msra.mxu1 %v1878_v50  ;;  %1856 = vmatprep.subr.bf16.mxu0 %v1855_v62  ;;  %v148_v45 = vrot.slane %v143_v43, %v2421_v42  ;;  %v152_v47 = vrot.slane %v143_v43, %v2426_v44  ;;  %v156_v60 = vrot.slane %v143_v43, %v2430_v57  ;;  %v755_v43 = vld [vmem:[#allocation10 + $0x248] sm:$0xff] }
  0xad   :  { %1880 = vmatprep.subr.bf16.mxu1 %v2267_v0 }
  0xaf   :  { %1858 = vmatpush1.bf16.msra.mxu0 %v1857_v3 }
  0xb0   :  { %1882 = vmatpush3.bf16.msra.mxu1 %v1881_v59  ;;  %1860 = vmatprep.subr.bf16.mxu0 %v1859_v9  ;;  %v1404_v59 = vld [vmem:[%s2513_s6] ss:$0 sm:$0xff] }
  0xb1   :  { %1883 = vmatprep.subr.bf16.mxu1 %v2267_v0  ;;  %v732_v9 = vld [vmem:[#allocation10 + $0x190] sm:$0xff] }
  0xb3   :  { %1862 = vmatpush1.bf16.msra.mxu0 %v1861_v13  ;;  %v740_v13 = vld [vmem:[#allocation10 + $0x1d0] sm:$0xff] }
  0xb4   :  { %1885 = vmatpush3.bf16.msra.mxu1 %v1884_v6  ;;  %1864 = vmatprep.subr.bf16.mxu0 %v1863_v18  ;;  %v730_v6 = vld [vmem:[#allocation10 + $0x180] sm:$0xff]  ;;  %v1928_v18 = vpack.c.bf16 %v735_v10, %v732_v9  ;;  %v1899_v21 = vpack.c.bf16 %v740_v13, %v737_v12  ;;  %v771_v9 = vld [vmem:[#allocation10 + $0x2c8] sm:$0xff]  ;;  %v773_v10 = vld [vmem:[#allocation10 + $0x2d8] sm:$0xff] }
  0xb5   :  { %1886 = vmatprep.subr.bf16.mxu1 %v2267_v0  ;;  %v1897_v16 = vpack.c.bf16 %v733_v8, %v730_v6  ;;  %v768_v8 = vld [vmem:[#allocation10 + $0x2b0] sm:$0xff] }
  0xb6   :  { %v772_v13 = vld [vmem:[#allocation10 + $0x2d0] sm:$0xff] }
  0xb7   :  { %1866 = vmatpush1.bf16.msra.mxu0 %v1865_v23  ;;  %v738_v23 = vld [vmem:[#allocation10 + $0x1c0] sm:$0xff] }
  0xb8   :  { %1888 = vmatpush3.bf16.msra.mxu1 %v1887_v17  ;;  %1868 = vmatprep.subr.bf16.mxu0 %v1867_v28  ;;  %v736_v17 = vld [vmem:[#allocation10 + $0x1b0] sm:$0xff]  ;;  %v742_v28 = vld [vmem:[#allocation10 + $0x1e0] sm:$0xff]  ;;  %v1931_v29 = vpack.c.bf16 %v741_v24, %v738_v23  ;;  %v955_v23 = vld [vmem:[#allocation8 + $0x188] sm:$0xff] }
  0xb9   :  { %1889 = vmatprep.subr.bf16.mxu1 %v2267_v0  ;;  %v958_v24 = vld [vmem:[#allocation8 + $0x1a0] sm:$0xff] }
  0xbb   :  { %1870 = vmatpush1.bf16.msra.mxu0 %v1869_v35  ;;  %v1905_v35 = vpack.c.bf16 %v745_v30, %v742_v28 }
  0xbc   :  { %1891 = vmatpush3.bf16.msra.mxu1 %v1890_v27  ;;  %1896 = vmatprep.subr.bf16.mxu0 %v1895_v37  ;;  %v1901_v27 = vpack.c.bf16 %v739_v22, %v736_v17  ;;  %v1934_v37 = vpack.c.bf16 %v747_v32, %v744_v31  ;;  %v774_v17 = vld [vmem:[#allocation10 + $0x2e0] sm:$0xff]  ;;  %v2447_v22 = vld [vmem:[#allocation5 + $0x8] sm:$0xff]  ;;  %v961_v31 = vld [vmem:[#allocation8 + $0x1b8] sm:$0xff] }
  0xbd   :  { %1892 = vmatprep.subr.bf16.mxu1 %v2267_v0  ;;  %v964_v32 = vld [vmem:[#allocation8 + $0x1d0] sm:$0xff] }
  0xc0   :  { %1894 = vmatpush3.bf16.msra.mxu1 %v1893_v36  ;;  %v748_v36 = vld [vmem:[#allocation10 + $0x210] sm:$0xff] }
  0xc1   :  { %1927 = vmatprep.subr.bf16.mxu1 %v2267_v0 }
 0x156   :  { %v297_v38 = vpop.f32.mrb[0].mxu1 }
 0x157   :  { %v1551_v39 = vpop.f32.mrb[1].mxu1  ;;  %v298_v2 = vadd.f32 %v297_v38, %v156_v60  ;;  %v1907_v38 = vpack.c.bf16 %v752_v34, %v749_v33  ;;  %v763_v60 = vld [vmem:[#allocation10 + $0x288] sm:$0xff]  ;;  %v1955_v33 = vpack.c.bf16 %v964_v32, %v961_v31  ;;  %v960_v34 = vld [vmem:[#allocation8 + $0x1b0] sm:$0xff]  ;;  %v998_v32 = vld [vmem:[#allocation8 + $0x2e0] sm:$0xff] }
 0x158   :  { %v751_v39 = vld [vmem:[#allocation10 + $0x228] sm:$0xff] }
 0x159   :  { %v999_v31 = vld [vmem:[#allocation8 + $0x2e8] sm:$0xff] }
 0x171   :  { %v415_v46 = vpop.f32.mrb[0].mxu0 }
 0x172   :  { %v2063_v48 = vadd.f32 %v415_v46, %v148_v45  ;;  %v417_v49 = vpop.f32.mrb[1].mxu0  ;;  %v758_v45 = vld [vmem:[#allocation10 + $0x260] sm:$0xff]  ;;  %v1909_v46 = vpack.c.bf16 %v751_v39, %v748_v36 }
 0x173   :  { %v2064_v51 = vadd.f32 %v417_v49, %v152_v47  ;;  %v754_v47 = vld [vmem:[#allocation10 + $0x240] sm:$0xff]  ;;  %v1911_v49 = vpack.c.bf16 %v758_v45, %v755_v43 }
 0x174   :  { %v1402_v50 = vmul.f32 -1.442695, %v2063_v48  ;;  %v1937_v48 = vpack.c.bf16 %v753_v41, %v750_v40  ;;  %v967_v40 = vld [vmem:[#allocation8 + $0x1e8] sm:$0xff]  ;;  %v970_v41 = vld [vmem:[#allocation8 + $0x200] sm:$0xff] }
 0x175   :  { %v1403_v52 = vmul.f32 -1.442695, %v2064_v51  ;;  %v756_v51 = vld [vmem:[#allocation10 + $0x250] sm:$0xff]  ;;  %v966_v43 = vld [vmem:[#allocation8 + $0x1e0] sm:$0xff]  ;;  %v1959_v45 = vpack.c.bf16 %v970_v41, %v967_v40 }
 0x176   :  { %2088 = vpow2.f32 %v1402_v50  ;;  %v486_v53 = vpop.f32.mrb[2].mxu1  ;;  %v757_v50 = vld [vmem:[#allocation10 + $0x258] sm:$0xff]  ;;  %v1405_v41 = vld [vmem:[%s2512_s5 + $0x3] sm:$0x7] }
 0x177   :  { %v1586_v54 = vpop.f32.mrb[3].mxu1  ;;  %2090 = vpow2.f32 %v1403_v52  ;;  %v511_v62 = vadd.f32 %v1404_v59, %v486_v53  ;;  %v759_v52 = vld [vmem:[#allocation10 + $0x268] sm:$0xff]  ;;  %v761_v53 = vld [vmem:[#allocation10 + $0x278] sm:$0xff] }
 0x178   :  { %v764_v54 = vld [vmem:[#allocation10 + $0x290] sm:$0xff] }
 0x179   :  { %v1915_v59 = vpack.c.bf16 %v764_v54, %v761_v53  ;;  %v972_v54 = vld [vmem:[#allocation8 + $0x210] sm:$0xff] }
 0x180   :  { %v2089_v55 = vpop.eup %2088 }
 0x181   :  { %v495_v56 = vadd.f32 1.0, %v2089_v55  ;;  %v2091_v58 = vpop.eup %2090  ;;  %v1913_v55 = vpack.c.bf16 %v757_v50, %v754_v47 }
 0x182   :  { %v502_v61 = vadd.f32 1.0, %v2091_v58  ;;  %v1940_v58 = vpack.c.bf16 %v759_v52, %v756_v51  ;;  %v973_v51 = vld [vmem:[#allocation8 + $0x218] sm:$0xff]  ;;  %v976_v52 = vld [vmem:[#allocation8 + $0x230] sm:$0xff] }
 0x183   :  { %2092 = vrcp.f32 %v495_v56  ;;  %v760_v56 = vld [vmem:[#allocation10 + $0x270] sm:$0xff]  ;;  %v1963_v53 = vpack.c.bf16 %v976_v52, %v973_v51 }
 0x184   :  { %2094 = vrcp.f32 %v502_v61  ;;  %v762_v61 = vld [vmem:[#allocation10 + $0x280] sm:$0xff] }
 0x18d   :  { %v2093_v63 = vpop.eup %2092 }
 0x18e   :  { %v512_v3 = vmul.f32 %v2093_v63, %v511_v62  ;;  %v2095_v5 = vpop.eup %2094  ;;  %v765_v62 = vld [vmem:[#allocation10 + $0x298] sm:$0xff]  ;;  %v767_v63 = vld [vmem:[#allocation10 + $0x2a8] sm:$0xff] }
 0x18f   :  { %v515_v7 = vsub.f32 1.0, %v2095_v5  ;;  %v517_v15 = vmul.f32 %v2095_v5, %v2403_v19  ;;  %v1903_v19 = vpack.c.bf16 %v746_v26, %v743_v25  ;;  %v1943_v5 = vpack.c.bf16 %v765_v62, %v762_v61  ;;  %v954_v26 = vld [vmem:[#allocation8 + $0x180] sm:$0xff]  ;;  %v979_v61 = vld [vmem:[#allocation8 + $0x248] sm:$0xff] }
 0x190   :  { %v513_v4 = vadd.f32 %v512_v3, %v298_v2  ;;  %v770_v2 = vld [vmem:[#allocation10 + $0x2c0] sm:$0xff]  ;;  %v1917_v3 = vpack.c.bf16 %v763_v60, %v760_v56  ;;  %v1951_v25 = vpack.c.bf16 %v958_v24, %v955_v23  ;;  %v993_v23 = vld [vmem:[#allocation8 + $0x2b8] sm:$0xff]  ;;  %v992_v24 = vld [vmem:[#allocation8 + $0x2b0] sm:$0xff] }
 0x191   :  { %v1919_v6 = vpack.c.bf16 %v770_v2, %v767_v63  ;;  %v982_v62 = vld [vmem:[#allocation8 + $0x260] sm:$0xff] }
 0x192   :  { %2096 = vtanh.f32 %v513_v4  ;;  %v766_v4 = vld [vmem:[#allocation10 + $0x2a0] sm:$0xff]  ;;  %v1967_v63 = vpack.c.bf16 %v982_v62, %v979_v61 }
 0x193   :  { %v978_v2 = vld [vmem:[#allocation8 + $0x240] sm:$0xff] }
 0x19c   :  { %v2097_v11 = vpop.eup %2096 }
 0x19d   :  { %v516_v14 = vmul.f32 %v2097_v11, %v515_v7  ;;  %v769_v7 = vld [vmem:[#allocation10 + $0x2b8] sm:$0xff]  ;;  %v776_v11 = vld [vmem:[#allocation10 + $0x2f0] sm:$0xff] }
 0x19e   :  { %v1921_v12 = vpack.c.bf16 %v769_v7, %v766_v4 }
 0x19f   :  { %v518_v20 = vadd.f32 %v517_v15, %v516_v14  ;;  %v1946_v14 = vpack.c.bf16 %v771_v9, %v768_v8  ;;  %v1923_v15 = vpack.c.bf16 %v776_v11, %v773_v10  ;;  %v985_v8 = vld [vmem:[#allocation8 + $0x278] sm:$0xff]  ;;  %v988_v9 = vld [vmem:[#allocation8 + $0x290] sm:$0xff] }
 0x1a0   :  { %v1971_v10 = vpack.c.bf16 %v988_v9, %v985_v8  ;;  %v984_v11 = vld [vmem:[#allocation8 + $0x270] sm:$0xff]  ;;  %v1167_v9 = vld [vmem:[#allocation10 + $0x328] sm:$0xff] }
 0x1a1   :  { %653 = vmatmul.mubr.f32.vlgmr.msra.gmra.mrb[2].mxu0 %v518_v20  ;;  %519 = vst [vmem:[#allocation11] sm:$0xff] %v518_v20  ;;  %1620 = vmatmul.mubr.f32.vlgmr.msra.gmra.mrb[4].mxu1 %v518_v20  ;;  %v1164_v8 = vld [vmem:[#allocation10 + $0x310] sm:$0xff] }
 0x1a2   :  { %1898 = vmatpush1.bf16.msra.mxu0 %v1897_v16  ;;  %1929 = vmatpush3.bf16.msra.mxu1 %v1928_v18  ;;  %v775_v16 = vld [vmem:[#allocation10 + $0x2e8] sm:$0xff]  ;;  %v777_v18 = vld [vmem:[#allocation10 + $0x2f8] sm:$0xff] }
 0x1a3   :  { %1900 = vmatprep.subr.bf16.mxu0 %v1899_v21  ;;  %1930 = vmatprep.subr.bf16.mxu1 %v2267_v0  ;;  %v1925_v20 = vpack.c.bf16 %v775_v16, %v772_v13  ;;  %v1949_v21 = vpack.c.bf16 %v777_v18, %v774_v17  ;;  %v986_v13 = vld [vmem:[#allocation8 + $0x280] sm:$0xff]  ;;  %v991_v16 = vld [vmem:[#allocation8 + $0x2a8] sm:$0xff] }
 0x1a4   :  { %842 = vmatprep.mubr.f32.mxu0 %v2268_v1  ;;  %1654 = vmatprep.mubr.msk.f32.mxu1 %vm2269_vm0, %v2268_v1  ;;  %v994_v17 = vld [vmem:[#allocation8 + $0x2c0] sm:$0xff] }
 0x1a6   :  { %1902 = vmatpush1.bf16.msra.mxu0 %v1901_v27  ;;  %1932 = vmatpush3.bf16.msra.mxu1 %v1931_v29  ;;  %v957_v27 = vld [vmem:[#allocation8 + $0x198] sm:$0xff]  ;;  %v956_v29 = vld [vmem:[#allocation8 + $0x190] sm:$0xff] }
 0x1a7   :  { %1904 = vmatprep.subr.bf16.mxu0 %v1903_v19  ;;  %1933 = vmatprep.subr.bf16.mxu1 %v2267_v0  ;;  %v1953_v28 = vpack.c.bf16 %v957_v27, %v954_v26  ;;  %v959_v19 = vld [vmem:[#allocation8 + $0x1a8] sm:$0xff]  ;;  %v997_v27 = vld [vmem:[#allocation8 + $0x2d8] sm:$0xff] }
 0x1a8   :  { %v1984_v30 = vpack.c.bf16 %v959_v19, %v956_v29  ;;  %v995_v26 = vld [vmem:[#allocation8 + $0x2c8] sm:$0xff] }
 0x1a9   :  { %v2002_v29 = vpack.c.bf16 %v995_v26, %v992_v24  ;;  %v1173_v24 = vld [vmem:[#allocation10 + $0x358] sm:$0xff]  ;;  %v1178_v26 = vld [vmem:[#allocation10 + $0x380] sm:$0xff] }
 0x1aa   :  { %1906 = vmatpush1.bf16.msra.mxu0 %v1905_v35  ;;  %1935 = vmatpush3.bf16.msra.mxu1 %v1934_v37  ;;  %v963_v35 = vld [vmem:[#allocation8 + $0x1c8] sm:$0xff]  ;;  %v962_v37 = vld [vmem:[#allocation8 + $0x1c0] sm:$0xff] }
 0x1ab   :  { %1908 = vmatprep.subr.bf16.mxu0 %v1907_v38  ;;  %1936 = vmatprep.subr.bf16.mxu1 %v2267_v0  ;;  %v1957_v36 = vpack.c.bf16 %v963_v35, %v960_v34  ;;  %v965_v38 = vld [vmem:[#allocation8 + $0x1d8] sm:$0xff]  ;;  %v1163_v34 = vld [vmem:[#allocation10 + $0x308] sm:$0xff]  ;;  %v1166_v35 = vld [vmem:[#allocation10 + $0x320] sm:$0xff] }
 0x1ac   :  { %v1987_v39 = vpack.c.bf16 %v965_v38, %v962_v37  ;;  %v2007_v38 = vpack.c.bf16 %v1166_v35, %v1163_v34  ;;  %v1180_v35 = vld [vmem:[#allocation10 + $0x390] sm:$0xff] }
 0x1ae   :  { %1910 = vmatpush1.bf16.msra.mxu0 %v1909_v46  ;;  %1938 = vmatpush3.bf16.msra.mxu1 %v1937_v48  ;;  %v969_v46 = vld [vmem:[#allocation8 + $0x1f8] sm:$0xff]  ;;  %v968_v48 = vld [vmem:[#allocation8 + $0x1f0] sm:$0xff] }
 0x1af   :  { %1912 = vmatprep.subr.bf16.mxu0 %v1911_v49  ;;  %1939 = vmatprep.subr.bf16.mxu1 %v2267_v0  ;;  %v1961_v47 = vpack.c.bf16 %v969_v46, %v966_v43  ;;  %v971_v49 = vld [vmem:[#allocation8 + $0x208] sm:$0xff]  ;;  %v576_v43 = vrot.slane %v1405_v41, %v2421_v42  ;;  %v580_v46 = vrot.slane %v1405_v41, %v2426_v44 }
 0x1b0   :  { %v1990_v50 = vpack.c.bf16 %v971_v49, %v968_v48 }
 0x1b2   :  { %1914 = vmatpush1.bf16.msra.mxu0 %v1913_v55  ;;  %1941 = vmatpush3.bf16.msra.mxu1 %v1940_v58  ;;  %v975_v55 = vld [vmem:[#allocation8 + $0x228] sm:$0xff]  ;;  %v974_v58 = vld [vmem:[#allocation8 + $0x220] sm:$0xff] }
 0x1b3   :  { %1916 = vmatprep.subr.bf16.mxu0 %v1915_v59  ;;  %1942 = vmatprep.subr.bf16.mxu1 %v2267_v0  ;;  %v1965_v56 = vpack.c.bf16 %v975_v55, %v972_v54  ;;  %v977_v59 = vld [vmem:[#allocation8 + $0x238] sm:$0xff] }
 0x1b4   :  { %v1993_v60 = vpack.c.bf16 %v977_v59, %v974_v58  ;;  %v1409_v58 = vld [vmem:[%s2513_s6 + $0x1] ss:$0 sm:$0xff]  ;;  %v584_v59 = vrot.slane %v1405_v41, %v2430_v57  ;;  %v1187_v41 = vld [vmem:[#allocation10 + $0x3c8] sm:$0xff] }
 0x1b6   :  { %1918 = vmatpush1.bf16.msra.mxu0 %v1917_v3  ;;  %1944 = vmatpush3.bf16.msra.mxu1 %v1943_v5  ;;  %v981_v3 = vld [vmem:[#allocation8 + $0x258] sm:$0xff]  ;;  %v980_v5 = vld [vmem:[#allocation8 + $0x250] sm:$0xff] }
 0x1b7   :  { %1920 = vmatprep.subr.bf16.mxu0 %v1919_v6  ;;  %1945 = vmatprep.subr.bf16.mxu1 %v2267_v0  ;;  %v1969_v4 = vpack.c.bf16 %v981_v3, %v978_v2  ;;  %v983_v6 = vld [vmem:[#allocation8 + $0x268] sm:$0xff] }
 0x1b8   :  { %v1996_v7 = vpack.c.bf16 %v983_v6, %v980_v5  ;;  %v1162_v5 = vld [vmem:[#allocation10 + $0x300] sm:$0xff] }
 0x1ba   :  { %1922 = vmatpush1.bf16.msra.mxu0 %v1921_v12  ;;  %1947 = vmatpush3.bf16.msra.mxu1 %v1946_v14  ;;  %v987_v12 = vld [vmem:[#allocation8 + $0x288] sm:$0xff] }
 0x1bb   :  { %1924 = vmatprep.subr.bf16.mxu0 %v1923_v15  ;;  %1948 = vmatprep.subr.bf16.mxu1 %v2267_v0  ;;  %v1973_v14 = vpack.c.bf16 %v987_v12, %v984_v11  ;;  %v989_v15 = vld [vmem:[#allocation8 + $0x298] sm:$0xff]  ;;  %v1172_v12 = vld [vmem:[#allocation10 + $0x350] sm:$0xff] }
 0x1bc   :  { %v1999_v18 = vpack.c.bf16 %v989_v15, %v986_v13  ;;  %v1169_v11 = vld [vmem:[#allocation10 + $0x338] sm:$0xff] }
 0x1be   :  { %1926 = vmatpush1.bf16.msra.mxu0 %v1925_v20  ;;  %1950 = vmatpush3.bf16.msra.mxu1 %v1949_v21  ;;  %v1975_v20 = vpack.c.bf16 %v994_v17, %v991_v16  ;;  %v990_v21 = vld [vmem:[#allocation8 + $0x2a0] sm:$0xff]  ;;  %v1168_v16 = vld [vmem:[#allocation10 + $0x330] sm:$0xff]  ;;  %v2040_v17 = vpack.c.bf16 %v1167_v9, %v1164_v8  ;;  %v1205_v8 = vld [vmem:[#allocation10 + $0x458] sm:$0xff] }
 0x1bf   :  { %1983 = vmatprep.subr.bf16.mxu1 %v2267_v0  ;;  %1952 = vmatprep.subr.bf16.mxu0 %v1951_v25  ;;  %v1977_v25 = vpack.c.bf16 %v993_v23, %v990_v21  ;;  %v1171_v21 = vld [vmem:[#allocation10 + $0x348] sm:$0xff]  ;;  %v1170_v23 = vld [vmem:[#allocation10 + $0x340] sm:$0xff]  ;;  %v1208_v9 = vld [vmem:[#allocation10 + $0x470] sm:$0xff] }
 0x1c1   :  { %843 = vmatmul.mubr.f32.vlgmr.msra.gmra.mrb[2].mxu0 %v2447_v22  ;;  %1655 = vmatmul.mubr.f32.vlgmr.msra.gmra.mrb[6].mxu1 %v2447_v22 }
 0x1c2   :  { %1084 = vmatprep.mubr.f32.mxu0 %v2268_v1  ;;  %1689 = vmatprep.mubr.msk.f32.mxu1 %vm2269_vm0, %v2268_v1 }
 0x1c3   :  { %1954 = vmatpush1.bf16.msra.mxu0 %v1953_v28  ;;  %1985 = vmatpush3.bf16.msra.mxu1 %v1984_v30  ;;  %v1000_v28 = vld [vmem:[#allocation8 + $0x2f0] sm:$0xff] }
 0x1c4   :  { %1986 = vmatprep.subr.bf16.mxu1 %v2267_v0  ;;  %1956 = vmatprep.subr.bf16.mxu0 %v1955_v33  ;;  %v1979_v19 = vpack.c.bf16 %v1000_v28, %v997_v27  ;;  %v996_v30 = vld [vmem:[#allocation8 + $0x2d0] sm:$0xff]  ;;  %v1001_v33 = vld [vmem:[#allocation8 + $0x2f8] sm:$0xff]  ;;  %v2013_v27 = vpack.c.bf16 %v1171_v21, %v1168_v16  ;;  %v1174_v28 = vld [vmem:[#allocation10 + $0x360] sm:$0xff] }
 0x1c5   :  { %v2005_v37 = vpack.c.bf16 %v1001_v33, %v998_v32  ;;  %v1181_v32 = vld [vmem:[#allocation10 + $0x398] sm:$0xff]  ;;  %v1184_v33 = vld [vmem:[#allocation10 + $0x3b0] sm:$0xff] }
 0x1c6   :  { %v1209_v16 = vld [vmem:[#allocation10 + $0x478] sm:$0xff] }
 0x1c7   :  { %1958 = vmatpush1.bf16.msra.mxu0 %v1957_v36  ;;  %1988 = vmatpush3.bf16.msra.mxu1 %v1987_v39  ;;  %v1981_v36 = vpack.c.bf16 %v999_v31, %v996_v30  ;;  %v1176_v30 = vld [vmem:[#allocation10 + $0x370] sm:$0xff]  ;;  %v1179_v31 = vld [vmem:[#allocation10 + $0x388] sm:$0xff] }
 0x1c8   :  { %1960 = vmatprep.subr.bf16.mxu0 %v1959_v45  ;;  %1989 = vmatprep.subr.bf16.mxu1 %v2267_v0 }
 0x1cb   :  { %1962 = vmatpush1.bf16.msra.mxu0 %v1961_v47  ;;  %1991 = vmatpush3.bf16.msra.mxu1 %v1990_v50 }
 0x1cc   :  { %1992 = vmatprep.subr.bf16.mxu1 %v2267_v0  ;;  %1964 = vmatprep.subr.bf16.mxu0 %v1963_v53 }
 0x1cf   :  { %1966 = vmatpush1.bf16.msra.mxu0 %v1965_v56  ;;  %1994 = vmatpush3.bf16.msra.mxu1 %v1993_v60 }
 0x1d0   :  { %1995 = vmatprep.subr.bf16.mxu1 %v2267_v0  ;;  %1968 = vmatprep.subr.bf16.mxu0 %v1967_v63 }
 0x1d3   :  { %1970 = vmatpush1.bf16.msra.mxu0 %v1969_v4  ;;  %1997 = vmatpush3.bf16.msra.mxu1 %v1996_v7  ;;  %v1165_v7 = vld [vmem:[#allocation10 + $0x318] sm:$0xff] }
 0x1d4   :  { %1998 = vmatprep.subr.bf16.mxu1 %v2267_v0  ;;  %1972 = vmatprep.subr.bf16.mxu0 %v1971_v10  ;;  %v2009_v15 = vpack.c.bf16 %v1165_v7, %v1162_v5  ;;  %v1201_v5 = vld [vmem:[#allocation10 + $0x438] sm:$0xff]  ;;  %v1203_v7 = vld [vmem:[#allocation10 + $0x448] sm:$0xff] }
 0x1d7   :  { %1974 = vmatpush1.bf16.msra.mxu0 %v1973_v14  ;;  %2000 = vmatpush3.bf16.msra.mxu1 %v1999_v18 }
 0x1d8   :  { %1976 = vmatprep.subr.bf16.mxu0 %v1975_v20  ;;  %2001 = vmatprep.subr.bf16.mxu1 %v2267_v0  ;;  %v2011_v20 = vpack.c.bf16 %v1172_v12, %v1169_v11  ;;  %v1204_v11 = vld [vmem:[#allocation10 + $0x450] sm:$0xff] }
 0x1db   :  { %1978 = vmatpush1.bf16.msra.mxu0 %v1977_v25  ;;  %2003 = vmatpush3.bf16.msra.mxu1 %v2002_v29  ;;  %v1175_v25 = vld [vmem:[#allocation10 + $0x368] sm:$0xff]  ;;  %v2043_v29 = vpack.c.bf16 %v1173_v24, %v1170_v23  ;;  %v1410_v24 = vld [vmem:[%s2512_s5 + $0x6] sm:$0x7] }
 0x1dc   :  { %1980 = vmatprep.subr.bf16.mxu0 %v1979_v19  ;;  %2004 = vmatprep.subr.bf16.mxu1 %v2267_v0  ;;  %v1177_v19 = vld [vmem:[#allocation10 + $0x378] sm:$0xff] }
 0x1dd   :  { %v2017_v34 = vpack.c.bf16 %v1177_v19, %v1174_v28 }
 0x1df   :  { %1982 = vmatpush1.bf16.msra.mxu0 %v1981_v36  ;;  %2006 = vmatpush3.bf16.msra.mxu1 %v2005_v37  ;;  %v2046_v36 = vpack.c.bf16 %v1179_v31, %v1176_v30  ;;  %v2019_v37 = vpack.c.bf16 %v1184_v33, %v1181_v32 }
 0x1e0   :  { %2008 = vmatprep.subr.bf16.mxu0 %v2007_v38  ;;  %2039 = vmatprep.subr.bf16.mxu1 %v2267_v0  ;;  %v1183_v38 = vld [vmem:[#allocation10 + $0x3a8] sm:$0xff] }
 0x274   :  { %v725_v39 = vpop.f32.mrb[4].mxu1 }
 0x275   :  { %v1621_v40 = vpop.f32.mrb[5].mxu1  ;;  %v726_v63 = vadd.f32 %v725_v39, %v584_v59  ;;  %v1182_v39 = vld [vmem:[#allocation10 + $0x3a0] sm:$0xff] }
 0x276   :  { %v1185_v40 = vld [vmem:[#allocation10 + $0x3b8] sm:$0xff]  ;;  %v1194_v59 = vld [vmem:[#allocation10 + $0x400] sm:$0xff] }
 0x294   :  { %v844_v45 = vpop.f32.mrb[2].mxu0  ;;  %v915_v47 = vpop.f32.mrb[6].mxu1 }
 0x295   :  { %v2065_v48 = vadd.f32 %v844_v45, %v576_v43  ;;  %v846_v49 = vpop.f32.mrb[3].mxu0  ;;  %v1656_v50 = vpop.f32.mrb[7].mxu1  ;;  %v941_v61 = vadd.f32 %v1409_v58, %v915_v47  ;;  %v1190_v43 = vld [vmem:[#allocation10 + $0x3e0] sm:$0xff]  ;;  %v2021_v45 = vpack.c.bf16 %v1183_v38, %v1180_v35  ;;  %v2049_v47 = vpack.c.bf16 %v1185_v40, %v1182_v39  ;;  %v1195_v58 = vld [vmem:[#allocation10 + $0x408] sm:$0xff] }
 0x296   :  { %v2066_v52 = vadd.f32 %v846_v49, %v580_v46  ;;  %v1186_v46 = vld [vmem:[#allocation10 + $0x3c0] sm:$0xff]  ;;  %v1188_v49 = vld [vmem:[#allocation10 + $0x3d0] sm:$0xff]  ;;  %v1191_v50 = vld [vmem:[#allocation10 + $0x3e8] sm:$0xff]  ;;  %v1016_v35 = vrot.slane %v1410_v24, %v2430_v57 }
 0x297   :  { %v1407_v51 = vmul.f32 -1.442695, %v2065_v48  ;;  %v1189_v48 = vld [vmem:[#allocation10 + $0x3d8] sm:$0xff] }
 0x298   :  { %v1408_v53 = vmul.f32 -1.442695, %v2066_v52  ;;  %v1196_v52 = vld [vmem:[#allocation10 + $0x410] sm:$0xff] }
 0x299   :  { %2098 = vpow2.f32 %v1407_v51  ;;  %v1193_v51 = vld [vmem:[#allocation10 + $0x3f8] sm:$0xff] }
 0x29a   :  { %2100 = vpow2.f32 %v1408_v53  ;;  %v2025_v53 = vpack.c.bf16 %v1189_v48, %v1186_v46 }
 0x2a3   :  { %v2099_v54 = vpop.eup %2098 }
 0x2a4   :  { %v925_v55 = vadd.f32 1.0, %v2099_v54  ;;  %v2101_v56 = vpop.eup %2100  ;;  %v1192_v54 = vld [vmem:[#allocation10 + $0x3f0] sm:$0xff] }
 0x2a5   :  { %v932_v60 = vadd.f32 1.0, %v2101_v56  ;;  %v2027_v56 = vpack.c.bf16 %v1196_v52, %v1193_v51 }
 0x2a6   :  { %2102 = vrcp.f32 %v925_v55  ;;  %v2052_v55 = vpack.c.bf16 %v1191_v50, %v1188_v49 }
 0x2a7   :  { %2104 = vrcp.f32 %v932_v60  ;;  %v1197_v60 = vld [vmem:[#allocation10 + $0x418] sm:$0xff] }
 0x2b0   :  { %v2103_v62 = vpop.eup %2102 }
 0x2b1   :  { %v942_v2 = vmul.f32 %v2103_v62, %v941_v61  ;;  %v2105_v4 = vpop.eup %2104  ;;  %v1199_v61 = vld [vmem:[#allocation10 + $0x428] sm:$0xff]  ;;  %v1202_v62 = vld [vmem:[#allocation10 + $0x440] sm:$0xff] }
 0x2b2   :  { %v945_v6 = vsub.f32 1.0, %v2105_v4  ;;  %v947_v14 = vmul.f32 %v2105_v4, %v2447_v22  ;;  %v2015_v22 = vpack.c.bf16 %v1178_v26, %v1175_v25  ;;  %v2031_v4 = vpack.c.bf16 %v1202_v62, %v1199_v61 }
 0x2b3   :  { %v943_v3 = vadd.f32 %v942_v2, %v726_v63  ;;  %v2029_v63 = vpack.c.bf16 %v1195_v58, %v1192_v54  ;;  %v1198_v2 = vld [vmem:[#allocation10 + $0x420] sm:$0xff]  ;;  %v1008_v25 = vrot.slane %v1410_v24, %v2421_v42  ;;  %v1414_v42 = vld [vmem:[%s2513_s6 + $0x2] ss:$0 sm:$0xff]  ;;  %s2228_s6 = scalar_lea.vmem %s1389_s30, 384 }
 0x2b4   :  { %p2229_p12 = scmp.ne.s32.totalorder %s1389_s30, %s2228_s6  ;;  %p2234_p0 = scmp.lt.s32.totalorder %s2228_s6, %s2228_s6 }
 0x2b5   :  { %2106 = vtanh.f32 %v943_v3  ;;  %v2055_v3 = vpack.c.bf16 %v1197_v60, %v1194_v59 }
 0x2b6   :  { %p2235_p1 = por %p2234_p0, %p2233_p13 }
 0x2b8   :  { %p2236_p2 = pnand %p2235_p1, %p2229_p12 }
 0x2bf   :  { %v2107_v10 = vpop.eup %2106 }
 0x2c0   :  { %v946_v13 = vmul.f32 %v2107_v10, %v945_v6  ;;  %v1200_v6 = vld [vmem:[#allocation10 + $0x430] sm:$0xff]  ;;  %v2033_v10 = vpack.c.bf16 %v1201_v5, %v1198_v2 }
 0x2c1   :  { %v2058_v12 = vpack.c.bf16 %v1203_v7, %v1200_v6 }
 0x2c2   :  { %v948_v18 = vadd.f32 %v947_v14, %v946_v13  ;;  %v2035_v13 = vpack.c.bf16 %v1208_v9, %v1205_v8  ;;  %v1207_v14 = vld [vmem:[#allocation10 + $0x468] sm:$0xff] }
 0x2c4   :  { %1085 = vmatmul.mubr.f32.vlgmr.msra.gmra.mrb[4].mxu0 %v948_v18  ;;  %950 = vst [vmem:[#allocation11 + $0x8] sm:$0xff] %v948_v18  ;;  %1690 = vmatmul.mubr.f32.vlgmr.msra.gmra.mrb[8].mxu1 %v948_v18 }
 0x2c5   :  { %2010 = vmatpush1.bf16.msra.mxu0 %v2009_v15  ;;  %2041 = vmatpush3.bf16.msra.mxu1 %v2040_v17  ;;  %v1206_v15 = vld [vmem:[#allocation10 + $0x460] sm:$0xff]  ;;  %v2037_v17 = vpack.c.bf16 %v1207_v14, %v1204_v11 }
 0x2c6   :  { %2012 = vmatprep.subr.bf16.mxu0 %v2011_v20  ;;  %2042 = vmatprep.subr.bf16.mxu1 %v2267_v0  ;;  %v2061_v18 = vpack.c.bf16 %v1209_v16, %v1206_v15  ;;  %v952_v20 = vld [vmem:[#allocation5 + $0x10] sm:$0xff] }
 0x2c7   :  { %1274 = vmatprep.mubr.f32.mxu0 %v2268_v1  ;;  %1724 = vmatprep.mubr.msk.f32.mxu1 %vm2269_vm0, %v2268_v1  ;;  %v2023_v1 = vpack.c.bf16 %v1190_v43, %v1187_v41 }
 0x2c9   :  { %2014 = vmatpush1.bf16.msra.mxu0 %v2013_v27  ;;  %2044 = vmatpush3.bf16.msra.mxu1 %v2043_v29  ;;  %v1012_v27 = vrot.slane %v1410_v24, %v2426_v44 }
 0x2ca   :  { %2016 = vmatprep.subr.bf16.mxu0 %v2015_v22  ;;  %2045 = vmatprep.subr.bf16.mxu1 %v2267_v0 }
 0x2cd   :  { %2018 = vmatpush1.bf16.msra.mxu0 %v2017_v34  ;;  %2047 = vmatpush3.bf16.msra.mxu1 %v2046_v36 }
 0x2ce   :  { %2020 = vmatprep.subr.bf16.mxu0 %v2019_v37  ;;  %2048 = vmatprep.subr.bf16.mxu1 %v2267_v0 }
 0x2d1   :  { %2022 = vmatpush1.bf16.msra.mxu0 %v2021_v45  ;;  %2050 = vmatpush3.bf16.msra.mxu1 %v2049_v47 }
 0x2d2   :  { %2024 = vmatprep.subr.bf16.mxu0 %v2023_v1  ;;  %2051 = vmatprep.subr.bf16.mxu1 %v2267_v0 }
 0x2d5   :  { %2026 = vmatpush1.bf16.msra.mxu0 %v2025_v53  ;;  %2053 = vmatpush3.bf16.msra.mxu1 %v2052_v55 }
 0x2d6   :  { %2028 = vmatprep.subr.bf16.mxu0 %v2027_v56  ;;  %2054 = vmatprep.subr.bf16.mxu1 %v2267_v0 }
 0x2d9   :  { %2030 = vmatpush1.bf16.msra.mxu0 %v2029_v63  ;;  %2056 = vmatpush3.bf16.msra.mxu1 %v2055_v3 }
 0x2da   :  { %2032 = vmatprep.subr.bf16.mxu0 %v2031_v4  ;;  %2057 = vmatprep.subr.bf16.mxu1 %v2267_v0 }
 0x2dd   :  { %2034 = vmatpush1.bf16.msra.mxu0 %v2033_v10  ;;  %2059 = vmatpush3.bf16.msra.mxu1 %v2058_v12 }
 0x2de   :  { %2036 = vmatprep.subr.bf16.mxu0 %v2035_v13  ;;  %2060 = vmatprep.subr.bf16.mxu1 %v2267_v0 }
 0x2e1   :  { %2038 = vmatpush1.bf16.msra.mxu0 %v2037_v17  ;;  %2062 = vmatpush3.bf16.msra.mxu1 %v2061_v18 }
 0x2e4   :  { %1275 = vmatmul.mubr.f32.vlgmr.msra.gmra.mrb[4].mxu0 %v952_v20  ;;  %1725 = vmatmul.mubr.f32.vlgmr.msra.gmra.mrb[10].mxu1 %v952_v20 }
 0x397   :  { %v1157_v21 = vpop.f32.mrb[8].mxu1 }
 0x398   :  { %v1691_v23 = vpop.f32.mrb[9].mxu1  ;;  %v1158_v38 = vadd.f32 %v1157_v21, %v1016_v35 }
 0x3b7   :  { %v1276_v26 = vpop.f32.mrb[4].mxu0  ;;  %v1347_v28 = vpop.f32.mrb[10].mxu1 }
 0x3b8   :  { %v2067_v29 = vadd.f32 %v1276_v26, %v1008_v25  ;;  %v1278_v22 = vpop.f32.mrb[5].mxu0  ;;  %v1726_v0 = vpop.f32.mrb[11].mxu1  ;;  %v1373_v36 = vadd.f32 %v1414_v42, %v1347_v28 }
 0x3b9   :  { %v2068_v30 = vadd.f32 %v1278_v22, %v1012_v27 }
 0x3ba   :  { %v1412_v19 = vmul.f32 -1.442695, %v2067_v29 }
 0x3bb   :  { %v1413_v31 = vmul.f32 -1.442695, %v2068_v30 }
 0x3bc   :  { %2108 = vpow2.f32 %v1412_v19 }
 0x3bd   :  { %2110 = vpow2.f32 %v1413_v31 }
 0x3c6   :  { %v2109_v32 = vpop.eup %2108 }
 0x3c7   :  { %v1357_v33 = vadd.f32 1.0, %v2109_v32  ;;  %v2111_v34 = vpop.eup %2110 }
 0x3c8   :  { %v1364_v44 = vadd.f32 1.0, %v2111_v34 }
 0x3c9   :  { %2112 = vrcp.f32 %v1357_v33 }
 0x3ca   :  { %2114 = vrcp.f32 %v1364_v44 }
 0x3d3   :  { %v2113_v37 = vpop.eup %2112 }
 0x3d4   :  { %v1374_v39 = vmul.f32 %v2113_v37, %v1373_v36  ;;  %v2115_v41 = vpop.eup %2114 }
 0x3d5   :  { %v1377_v43 = vsub.f32 1.0, %v2115_v41  ;;  %v1379_v47 = vmul.f32 %v2115_v41, %v952_v20 }
 0x3d6   :  { %v1375_v40 = vadd.f32 %v1374_v39, %v1158_v38 }
 0x3d8   :  { %2116 = vtanh.f32 %v1375_v40 }
 0x3e2   :  { %v2117_v45 = vpop.eup %2116 }
 0x3e3   :  { %v1378_v46 = vmul.f32 %v2117_v45, %v1377_v43 }
 0x3e5   :  { %v1380_v1 = vadd.f32 %v1379_v47, %v1378_v46 }
 0x3e7   :  { %1382 = vst [vmem:[#allocation11 + $0x10] sm:$0xff] %v1380_v1 }
 0x3e8   :  { %2239 = shalt.err (!%p2236_p2)
}
 0x3e9   :  { %s2240_s8 = scalar_lea.hbm %s2514_s7, 384 }
 0x3ea   :  { %p2241_p3 = scmp.ne.s32.totalorder %s2514_s7, %s2240_s8  ;;  %p2244_p4 = scmp.lt.u32.totalorder %s2240_s8, %s2514_s7 }
 0x3ec   :  { %p2246_p5 = pnand %p2244_p4, %p2241_p3 }
 0x3ee   :  { %2249 = shalt.err (!%p2246_p5)
}
 0x3ef   :  { %1394 = dma.vmem_to_hbm [thread:$0]  %s1389_s30, 384, %s2514_s7, [#allocation4], %s2259_s11, %s2259_s11, %s2260_s12  }
 0x3f0   :  { %2256 = dma.done.wait [#allocation4], 384  }
 0x3f1   :  { %2257 = vsyncadd [#allocation4], 4294966912 }
 0x3f2   :  { %1398 = vsyncpa [#allocation3], 1 }
 0x3f3   :  { %1399 = vsyncpa [#allocation6], 1 }
 0x3f4   :  { %1400 = vsyncpa [#allocation9], 1 }
 0x3f5   :  { %1401 = vsyncpa [#allocation4], 1 }

</bundles_post_ra>
